<compile_context>
chip_gen: v5e
topology: v5e:2x2
jax: 0.10.0
libtpu: 0.0.40
codegen_flags: <defaults>
</compile_context>

<pallas_src>
import numpy as np
import jax
import jax.numpy as jnp
from jax.experimental import pallas as pl
from jax.experimental.pallas import tpu as pltpu

OUT_H = 180
OUT_W = 180


def _bilinear_matrix(in_size: int, out_size: int) -> np.ndarray:
    """(out_size, in_size) weights reproducing PyTorch bilinear, align_corners=False."""
    scale = in_size / out_size
    o = np.arange(out_size, dtype=np.float64)
    src = (o + 0.5) * scale - 0.5
    src = np.maximum(src, 0.0)
    i0 = np.minimum(np.floor(src).astype(np.int64), in_size - 1)
    lam = src - i0
    i1 = np.minimum(i0 + 1, in_size - 1)
    m = np.zeros((out_size, in_size), dtype=np.float64)
    np.add.at(m, (np.arange(out_size), i0), 1.0 - lam)
    np.add.at(m, (np.arange(out_size), i1), lam)
    return m.astype(np.float32)


def _plan_tiles(N, C, HW, x_itemsize, out_itemsize, const_bytes):
    """Pick (batch-fold nb, channel tile ct, vmem_limit_bytes) from the actual
    generation's VMEM capacity.  Accounts for double-buffered x blocks, double-
    buffered output blocks, the resize constants and the f32 accumulator."""
    try:
        info = pltpu.get_tpu_info()
        cap = int(getattr(info, "vmem_capacity_bytes", 64 << 20))
    except Exception:
        cap = 64 << 20                      # conservative: v7x per-core VMEM
    cap = max(cap, 32 << 20)
    vmem_limit = max(min(cap - (8 << 20), 112 << 20), 24 << 20)
    budget = int(vmem_limit * 0.85)

    out_img = OUT_H * OUT_W * out_itemsize
    acc_img = HW * 4

    def need(nb, ct):
        nk = C // ct
        return (2 * nb * ct * HW * x_itemsize      # double-buffered x blocks
                + 2 * nb * out_img                 # double-buffered output blocks
                + 2 * const_bytes                  # resize constants (pipelined x2)
                + (nb * acc_img if nk > 1 else 0)  # f32 accumulator scratch
                + (1 << 20))                       # w row, bias, compiler slack

    nb_cands = [d for d in range(min(N, 8), 0, -1) if N % d == 0]
    if N >= 2:
        # Keep >=2 steps on the parallel batch axis so v7x's two TensorCores
        # both get work (review item: batch parallelism on megacore).
        nb_cands = [d for d in nb_cands if N // d >= 2] or [1]
    ct_cands = [c for c in range(C, 0, -128) if c % 128 == 0 and C % c == 0] or [C]

    # Phase 1: single reduction step (nk == 1), largest batch fold that fits.
    for nb in nb_cands:
        if need(nb, C) <= budget:
            return nb, C, vmem_limit
    # Phase 2: channel-tiled reduction, one image per step, largest tile that fits.
    for ct in ct_cands:
        if need(1, ct) <= budget:
            return 1, ct, vmem_limit
    return 1, ct_cands[-1], vmem_limit          # best effort (smallest channel tile)


def _make_kernel(nb, nk, H, W, fused):
    """Kernel factory.  `fused`: resize via H*W-expanded constants (one matmul,
    no relayout).  Otherwise: true separable resize A @ conv(H,W) @ B^T."""

    def _resize(conv_row, r1, r2):
        if fused:
            # out[oh, ow] = sum_j r1[oh, j] * conv[j] * r2[j, ow]   (r1=AP, r2=QB)
            return jnp.dot(r1 * conv_row, r2, preferred_element_type=jnp.float32)
        # Separable: one small relayout of HW elements, then two tiny matmuls.
        conv_hw = conv_row.reshape(H, W)
        t = jnp.dot(r1, conv_hw, preferred_element_type=jnp.float32)    # (180, W)
        return jnp.dot(t, r2, preferred_element_type=jnp.float32)       # (180, 180)

    if nk == 1:
        # Specialized single-reduction-step path: no scratch, no pl.when.
        def kernel(x_ref, w_ref, r1_ref, r2_ref, bias_ref, o_ref):
            w = w_ref[...]
            r1 = r1_ref[...]
            r2 = r2_ref[...]
            b = bias_ref[0, 0]
            for i in range(nb):                      # static unroll, nb <= 8
                conv = jnp.dot(w, x_ref[i], preferred_element_type=jnp.float32)
                o_ref[i] = (_resize(conv, r1, r2) + b).astype(o_ref.dtype)
        return kernel

    def kernel(x_ref, w_ref, r1_ref, r2_ref, bias_ref, o_ref, acc_ref):
        k = pl.program_id(1)

        @pl.when(k == 0)
        def _init():
            acc_ref[...] = jnp.zeros_like(acc_ref)

        w = w_ref[...]
        for i in range(nb):
            acc_ref[pl.ds(i, 1), :] += jnp.dot(w, x_ref[i],
                                               preferred_element_type=jnp.float32)

        @pl.when(k == pl.num_programs(1) - 1)
        def _finalize():
            r1 = r1_ref[...]
            r2 = r2_ref[...]
            b = bias_ref[0, 0]
            for i in range(nb):
                conv = acc_ref[pl.ds(i, 1), :]                          # (1, HW) f32
                o_ref[i] = (_resize(conv, r1, r2) + b).astype(o_ref.dtype)

    return kernel


@jax.jit
def cam_feature_without_depth(x_nchw, conv_w, conv_b):
    """x_nchw: (N, 768, H, W); conv_w: (1, 768, 1, 1); conv_b: (1,). -> (N, 1, 180, 180)."""
    N, C, H, W = x_nchw.shape
    HW = H * W
    out_dtype = x_nchw.dtype

    # bf16 feed for the HBM-bound x stream and the conv weight; f32 accumulation
    # happens inside the kernel.  (Ideally the producer emits bf16 so this cast
    # fuses away upstream.)
    cdtype = jnp.bfloat16
    x_flat = x_nchw.reshape(N, C, HW).astype(cdtype)   # metadata-only reshape + cast
    w_row = conv_w.reshape(1, C).astype(cdtype)
    bias = conv_b.reshape(1, 1).astype(jnp.float32)

    a = _bilinear_matrix(H, OUT_H)                     # (180, H), rows sum to 1
    b = _bilinear_matrix(W, OUT_W)                     # (180, W), rows sum to 1

    # Small feature maps: fold the resize into one matmul via H*W-expanded
    # constants (no in-kernel relayout).  Large feature maps: true separable
    # resize (constants shrink to KBs, MXU work drops ~100x, VMEM stays small).
    fused = HW * (OUT_H + OUT_W) * 4 <= (2 << 20)
    if fused:
        r1 = jnp.asarray(np.repeat(a, W, axis=1))      # (180, HW): AP[oh, h*W+w] = A[oh, h]
        r2 = jnp.asarray(np.tile(b.T, (H, 1)))         # (HW, 180): QB[h*W+w, ow] = B[ow, w]
    else:
        r1 = jnp.asarray(a)                            # (180, H)
        r2 = jnp.asarray(b.T)                          # (W, 180)
    const_bytes = (r1.size + r2.size) * 4              # resize constants stay f32

    nb, ct, vmem_limit = _plan_tiles(N, C, HW, x_flat.dtype.itemsize,
                                     x_nchw.dtype.itemsize, const_bytes)
    nk = C // ct
    n_steps = N // nb

    kernel = _make_kernel(nb, nk, H, W, fused)

    if nk == 1:
        grid = (n_steps,)
        x_map = lambda n: (n, 0, 0)
        w_map = lambda n: (0, 0)
        c_map = lambda n: (0, 0)
        o_map = lambda n: (n, 0, 0)
        scratch = []
        semantics = ("parallel",)
    else:
        grid = (n_steps, nk)                           # channel-reduction axis last
        x_map = lambda n, k: (n, k, 0)
        w_map = lambda n, k: (0, k)
        c_map = lambda n, k: (0, 0)
        o_map = lambda n, k: (n, 0, 0)
        scratch = [pltpu.VMEM((nb, HW), jnp.float32)]
        semantics = ("parallel", "arbitrary")

    out = pl.pallas_call(
        kernel,
        out_shape=jax.ShapeDtypeStruct((N, OUT_H, OUT_W), out_dtype),
        grid_spec=pltpu.PrefetchScalarGridSpec(
            num_scalar_prefetch=0,
            grid=grid,
            in_specs=[
                pl.BlockSpec((nb, ct, HW), x_map),
                pl.BlockSpec((1, ct), w_map),
                pl.BlockSpec(tuple(r1.shape), c_map),  # constant block, DMA'd once
                pl.BlockSpec(tuple(r2.shape), c_map),  # constant block, DMA'd once
                pl.BlockSpec(memory_space=pltpu.MemorySpace.SMEM),
            ],
            out_specs=pl.BlockSpec((nb, OUT_H, OUT_W), o_map),
            scratch_shapes=scratch,
        ),
        compiler_params=pltpu.CompilerParams(
            dimension_semantics=semantics,
            vmem_limit_bytes=int(vmem_limit)),
    )(x_flat, w_row, r1, r2, bias)

    # Free rank-restoring reshape to the PyTorch NCHW output layout.
    return out.reshape(N, 1, OUT_H, OUT_W)


if __name__ == "__main__":
    key = jax.random.PRNGKey(0)
    kx, kw, kb = jax.random.split(key, 3)

    # Module hard-codes 768 input channels; keep batch/spatial small.
    N, C, H, W = 2, 768, 16, 16
    x = jax.random.normal(kx, (N, C, H, W), dtype=jnp.float32)

    bound = 1.0 / np.sqrt(C)
    conv_w = jax.random.uniform(kw, (1, C, 1, 1), jnp.float32, -bound, bound)
    conv_b = jax.random.uniform(kb, (1,), jnp.float32, -bound, bound)

    out = jax.block_until_ready(cam_feature_without_depth(x, conv_w, conv_b))
    assert out.shape == (N, 1, OUT_H, OUT_W)

    # Reference: apply the SAME bf16 input quantization the kernel uses (the
    # deliberate perf tradeoff), then f32 HIGHEST-precision math everywhere.
    # Remaining differences are MXU f32 accumulation/pass effects (<< 1e-2).
    hi = jax.lax.Precision.HIGHEST
    x_q = x.astype(jnp.bfloat16).astype(jnp.float32)
    w_q = conv_w.reshape(C).astype(jnp.bfloat16).astype(jnp.float32)
    a_mat = jnp.asarray(_bilinear_matrix(H, OUT_H))    # (180, H)
    b_mat = jnp.asarray(_bilinear_matrix(W, OUT_W))    # (180, W)
    conv_ref = jnp.einsum('nchw,c->nhw', x_q, w_q, precision=hi) + conv_b[0]
    ref = jnp.einsum('oh,nhw,pw->nop', a_mat, conv_ref, b_mat, precision=hi)
    if not jnp.allclose(out[:, 0], ref, atol=1e-2, rtol=1e-2):
        raise SystemExit("numerical mismatch")
    print("KERNEL_OK")
</pallas_src>

<mosaic_0001>
module attributes {stable_mosaic.version = 11 : i64} {
  func.func @kernel(%arg0: i32, %arg1: memref<1x768x256xbf16, #tpu.memory_space<vmem>>, %arg2: memref<1x768xbf16, #tpu.memory_space<vmem>>, %arg3: memref<180x256xf32, #tpu.memory_space<vmem>>, %arg4: memref<256x180xf32, #tpu.memory_space<vmem>>, %arg5: memref<1x1xf32, #tpu.memory_space<smem>>, %arg6: memref<1x180x180xf32, #tpu.memory_space<vmem>>) attributes {dimension_semantics = [#tpu.dimension_semantics<parallel>], iteration_bounds = array<i64: 2>, scalar_prefetch = 0 : i64, scratch_operands = 0 : i64, tpu.core_type = #tpu.core_type<tc>, window_params = [{transform_indices = @transform_0, window_bounds = array<i64: 1, 768, 256>}, {pipeline_mode = #tpu.pipeline_mode<synchronous>, transform_indices = @transform_1, window_bounds = array<i64: 1, 768>}, {pipeline_mode = #tpu.pipeline_mode<synchronous>, transform_indices = @transform_2, window_bounds = array<i64: 180, 256>}, {pipeline_mode = #tpu.pipeline_mode<synchronous>, transform_indices = @transform_3, window_bounds = array<i64: 256, 180>}, {transform_indices = @transform_4, window_bounds = array<i64: 1, 1>}, {transform_indices = @transform_5, window_bounds = array<i64: 1, 180, 180>}]} {
    %c0 = arith.constant 0 : index
    %c0_0 = arith.constant 0 : index
    %0 = vector.load %arg2[%c0, %c0_0] : memref<1x768xbf16, #tpu.memory_space<vmem>>, vector<1x768xbf16>
    %c0_1 = arith.constant 0 : index
    %c0_2 = arith.constant 0 : index
    %1 = vector.load %arg3[%c0_1, %c0_2] : memref<180x256xf32, #tpu.memory_space<vmem>>, vector<180x256xf32>
    %c0_3 = arith.constant 0 : index
    %c0_4 = arith.constant 0 : index
    %2 = vector.load %arg4[%c0_3, %c0_4] : memref<256x180xf32, #tpu.memory_space<vmem>>, vector<256x180xf32>
    %c0_5 = arith.constant 0 : index
    %c0_6 = arith.constant 0 : index
    %3 = memref.load %arg5[%c0_5, %c0_6] : memref<1x1xf32, #tpu.memory_space<smem>>
    %c0_7 = arith.constant 0 : index
    %c0_8 = arith.constant 0 : index
    %c0_9 = arith.constant 0 : index
    %4 = vector.load %arg1[%c0_7, %c0_8, %c0_9] : memref<1x768x256xbf16, #tpu.memory_space<vmem>>, vector<1x768x256xbf16>
    %5 = vector.shape_cast %4 : vector<1x768x256xbf16> to vector<768x256xbf16>
    %cst = arith.constant dense<0.000000e+00> : vector<1x256xf32>
    %6 = tpu.matmul %0, %5, %cst {dimension_numbers = #tpu.dot_dimension_numbers<[1], [0], [0], [1], [0, 0, 1, 1], [], []>} : vector<1x768xbf16>, vector<768x256xbf16>, vector<1x256xf32> -> vector<1x256xf32>
    %7 = vector.broadcast %6 : vector<1x256xf32> to vector<180x256xf32>
    %8 = arith.mulf %1, %7 : vector<180x256xf32>
    %cst_10 = arith.constant dense<0.000000e+00> : vector<180x180xf32>
    %9 = tpu.matmul %8, %2, %cst_10 {dimension_numbers = #tpu.dot_dimension_numbers<[1], [0], [0], [1], [0, 0, 1, 1], [], []>} : vector<180x256xf32>, vector<256x180xf32>, vector<180x180xf32> -> vector<180x180xf32>
    %10 = vector.broadcast %3 : f32 to vector<180x180xf32>
    %11 = arith.addf %9, %10 : vector<180x180xf32>
    %c0_11 = arith.constant 0 : index
    %c0_12 = arith.constant 0 : index
    %c0_13 = arith.constant 0 : index
    %12 = vector.load %arg6[%c0_11, %c0_12, %c0_13] : memref<1x180x180xf32, #tpu.memory_space<vmem>>, vector<1x180x180xf32>
    %13 = vector.shape_cast %12 : vector<1x180x180xf32> to vector<180x180xf32>
    %14 = vector.shape_cast %11 : vector<180x180xf32> to vector<1x180x180xf32>
    tpu.vector_store %arg6[%c0_11, %c0_12, %c0_13], %14 {strides = array<i32>} : memref<1x180x180xf32, #tpu.memory_space<vmem>>, vector<1x180x180xf32>,
    return
  }
  func.func @transform_0(%arg0: i32) -> (i32, i32, i32) {
    %c0_i32 = arith.constant 0 : i32
    %c0_i32_0 = arith.constant 0 : i32
    %c0_i32_1 = arith.constant 0 : i32
    return %arg0, %c0_i32, %c0_i32_0 : i32, i32, i32
  }
  func.func @transform_1(%arg0: i32) -> (i32, i32) {
    %c0_i32 = arith.constant 0 : i32
    %c0_i32_0 = arith.constant 0 : i32
    %c0_i32_1 = arith.constant 0 : i32
    return %c0_i32, %c0_i32_0 : i32, i32
  }
  func.func @transform_2(%arg0: i32) -> (i32, i32) {
    %c0_i32 = arith.constant 0 : i32
    %c0_i32_0 = arith.constant 0 : i32
    %c0_i32_1 = arith.constant 0 : i32
    return %c0_i32, %c0_i32_0 : i32, i32
  }
  func.func @transform_3(%arg0: i32) -> (i32, i32) {
    %c0_i32 = arith.constant 0 : i32
    %c0_i32_0 = arith.constant 0 : i32
    %c0_i32_1 = arith.constant 0 : i32
    return %c0_i32, %c0_i32_0 : i32, i32
  }
  func.func @transform_4(%arg0: i32) -> (i32, i32) {
    %c0_i32 = arith.constant 0 : i32
    %c0_i32_0 = arith.constant 0 : i32
    %c0_i32_1 = arith.constant 0 : i32
    return %c0_i32, %c0_i32_0 : i32, i32
  }
  func.func @transform_5(%arg0: i32) -> (i32, i32, i32) {
    %c0_i32 = arith.constant 0 : i32
    %c0_i32_0 = arith.constant 0 : i32
    %c0_i32_1 = arith.constant 0 : i32
    return %arg0, %c0_i32, %c0_i32_0 : i32, i32, i32
  }
}

</mosaic_0001>

<bundles_post_ra>
// kernel: cam_feature_without_depth.1
= control target key start
LH: loop header
LB: loop body
LE: loop exit
PB: predicated region body
PF: predicated region fallthrough
CT: control target
= control target key end

     0   :  { %s2120_s20 = smov 0   ;;  %s2881_s0 = inlined_call_operand.vmem [shape: bf16[2,768,256], index: 0, kind: input, shape index: {}]   ;;  %s2882_s1 = inlined_call_operand.vmem [shape: bf16[1,768], index: 1, kind: input, shape index: {}]   ;;  %s2883_s2 = inlined_call_operand.vmem [shape: f32[180,256], index: 2, kind: input, shape index: {}]   ;;  %s2884_s3 = inlined_call_operand.vmem [shape: f32[256,180], index: 3, kind: input, shape index: {}]   ;;  %s2885_s4 = inlined_call_operand.<no memory space> [shape: f32[1,1], index: 4, kind: input, shape index: {}]   ;;  %s2886_s5 = inlined_call_operand.vmem [shape: f32[2,180,180], index: 5, kind: output, shape index: {}]  }
   0x1   :  { %10 = sst [smem:[#allocation2]] %s2885_s4 }
   0x2 LB: > { %s1580_s21 = sadd.s32 4294967295, %s2085_s20   ;;  %p1584_p0 = scmp.ge.s32.totalorder %s2085_s20, 1  ;;  %s2085_s20 = sphi %s2120_s20, %s16_s20  }
   0x3   : > { %p188_p1 = scmp.lt.s32.totalorder %s2085_s20, 3 }
   0x5   : > { %p189_p2 = pnand %p1584_p0, %p188_p1 }
   0x6   : > { %p216_p3 = scmp.lt.s32.totalorder (!%p189_p2), %s1580_s21, 1  ;;  %s337_s8 = sld [smem:[#allocation2]] (!%p189_p2) }
   0x7   : > { %192 = sbr.rel (%p189_p2) target bundleno = 567 (0x237), region = 40 }
   0xc   : > { %s2888_s21 = smov (!%p216_p3, %s1580_s21), 1  ;;  %vm1478_vm0 = vcmask 424960   ;;  %vm1523_vm1 = vcmask 420864  }
   0xd   : > { %s2069_s4 = smul.u32 768, %s2888_s21 }
   0xe   : > { %s2070_s13 = smul.u32 368, %s2888_s21 }
   0xf   : > { %s2134_s24 = scalar_lea.vmem %s2881_s0, %s2069_s4 }
  0x10   : > { %v1645_v0 = vld [vmem:[%s2134_s24 + $0x70] sm:$0xf]  ;;  %v1988_v1 = vld [vmem:[%s2134_s24 + $0x74] sm:$0xf0]  ;;  %v1637_v11 = vld [vmem:[%s2134_s24 + $0x60] sm:$0xf]  ;;  %s2717_s18 = scalar_lea.vmem %s2886_s5, %s2070_s13 }
  0x11   : > { %v1709_v2 = vld [vmem:[%s2134_s24 + $0xf0] sm:$0xf]  ;;  %v1646_v3 = vor.u32 %v1988_v1, %v1645_v0  ;;  %v2004_v4 = vld [vmem:[%s2134_s24 + $0xf4] sm:$0xf0]  ;;  %v1986_v13 = vld [vmem:[%s2134_s24 + $0x64] sm:$0xf0] }
  0x12   : > { %v1773_v5 = vld [vmem:[%s2134_s24 + $0x170] sm:$0xf]  ;;  %v2020_v6 = vld [vmem:[%s2134_s24 + $0x174] sm:$0xf0]  ;;  %v1710_v7 = vor.u32 %v2004_v4, %v1709_v2  ;;  %v1701_v14 = vld [vmem:[%s2134_s24 + $0xe0] sm:$0xf]  ;;  %v1638_v16 = vor.u32 %v1986_v13, %v1637_v11 }
  0x13   : > { %v1774_v8 = vor.u32 %v2020_v6, %v1773_v5  ;;  %v1837_v9 = vld [vmem:[%s2134_s24 + $0x1f0] sm:$0xf]  ;;  %v2036_v10 = vld [vmem:[%s2134_s24 + $0x1f4] sm:$0xf0]  ;;  %928 = vmatpush.bf16.msra.mxu0 %v1646_v3  ;;  %v2002_v15 = vld [vmem:[%s2134_s24 + $0xe4] sm:$0xf0] }
  0x14   : > { %v1838_v12 = vor.u32 %v2036_v10, %v1837_v9  ;;  %941 = vmatpush.bf16.msra.mxu1 %v1710_v7  ;;  %v1702_v17 = vor.u32 %v2002_v15, %v1701_v14  ;;  %v1765_v18 = vld [vmem:[%s2134_s24 + $0x160] sm:$0xf]  ;;  %v2018_v19 = vld [vmem:[%s2134_s24 + $0x164] sm:$0xf0]  ;;  %v1629_v23 = vld [vmem:[%s2134_s24 + $0x50] sm:$0xf] }
  0x15   : > { %954 = vmatpush.bf16.msra.mxu2 %v1774_v8  ;;  %v1829_v20 = vld [vmem:[%s2134_s24 + $0x1e0] sm:$0xf]  ;;  %v1766_v21 = vor.u32 %v2018_v19, %v1765_v18  ;;  %v2034_v22 = vld [vmem:[%s2134_s24 + $0x1e4] sm:$0xf0]  ;;  %v1984_v24 = vld [vmem:[%s2134_s24 + $0x54] sm:$0xf0] }
  0x16   : > { %967 = vmatpush.bf16.msra.mxu3 %v1838_v12  ;;  %v1830_v25 = vor.u32 %v2034_v22, %v1829_v20  ;;  %v1693_v26 = vld [vmem:[%s2134_s24 + $0xd0] sm:$0xf]  ;;  %v2000_v27 = vld [vmem:[%s2134_s24 + $0xd4] sm:$0xf0]  ;;  %v1630_v29 = vor.u32 %v1984_v24, %v1629_v23  ;;  %v1621_v35 = vld [vmem:[%s2134_s24 + $0x40] sm:$0xf] }
  0x17   : > { %v1757_v28 = vld [vmem:[%s2134_s24 + $0x150] sm:$0xf]  ;;  %929 = vmatpush.bf16.msra.mxu0 %v1638_v16  ;;  %v2016_v30 = vld [vmem:[%s2134_s24 + $0x154] sm:$0xf0]  ;;  %v1694_v33 = vor.u32 %v2000_v27, %v1693_v26  ;;  %v1982_v36 = vld [vmem:[%s2134_s24 + $0x44] sm:$0xf0] }
  0x18   : > { %v1821_v31 = vld [vmem:[%s2134_s24 + $0x1d0] sm:$0xf]  ;;  %v2032_v32 = vld [vmem:[%s2134_s24 + $0x1d4] sm:$0xf0]  ;;  %942 = vmatpush.bf16.msra.mxu1 %v1702_v17  ;;  %v1758_v34 = vor.u32 %v2016_v30, %v1757_v28  ;;  %v1685_v37 = vld [vmem:[%s2134_s24 + $0xc0] sm:$0xf]  ;;  %v1622_v44 = vor.u32 %v1982_v36, %v1621_v35 }
  0x19   : > { %955 = vmatpush.bf16.msra.mxu2 %v1766_v21  ;;  %v1822_v38 = vor.u32 %v2032_v32, %v1821_v31  ;;  %v1998_v39 = vld [vmem:[%s2134_s24 + $0xc4] sm:$0xf0]  ;;  %v1749_v40 = vld [vmem:[%s2134_s24 + $0x140] sm:$0xf]  ;;  %v1613_v47 = vld [vmem:[%s2134_s24 + $0x30] sm:$0xf] }
  0x1a   : > { %968 = vmatpush.bf16.msra.mxu3 %v1830_v25  ;;  %v2014_v41 = vld [vmem:[%s2134_s24 + $0x144] sm:$0xf0]  ;;  %v1813_v42 = vld [vmem:[%s2134_s24 + $0x1c0] sm:$0xf]  ;;  %v1686_v45 = vor.u32 %v1998_v39, %v1685_v37  ;;  %v1980_v48 = vld [vmem:[%s2134_s24 + $0x34] sm:$0xf0] }
  0x1b   : > { %v2030_v43 = vld [vmem:[%s2134_s24 + $0x1c4] sm:$0xf0]  ;;  %930 = vmatpush.bf16.msra.mxu0 %v1630_v29  ;;  %v1750_v46 = vor.u32 %v2014_v41, %v1749_v40  ;;  %v1677_v49 = vld [vmem:[%s2134_s24 + $0xb0] sm:$0xf]  ;;  %v1996_v51 = vld [vmem:[%s2134_s24 + $0xb4] sm:$0xf0]  ;;  %v1614_v56 = vor.u32 %v1980_v48, %v1613_v47 }
  0x1c   : > { %943 = vmatpush.bf16.msra.mxu1 %v1694_v33  ;;  %v1814_v50 = vor.u32 %v2030_v43, %v1813_v42  ;;  %v1741_v52 = vld [vmem:[%s2134_s24 + $0x130] sm:$0xf]  ;;  %v2012_v53 = vld [vmem:[%s2134_s24 + $0x134] sm:$0xf0]  ;;  %v1678_v57 = vor.u32 %v1996_v51, %v1677_v49  ;;  %v1605_v59 = vld [vmem:[%s2134_s24 + $0x20] sm:$0xf] }
  0x1d   : > { %956 = vmatpush.bf16.msra.mxu2 %v1758_v34  ;;  %v1805_v54 = vld [vmem:[%s2134_s24 + $0x1b0] sm:$0xf]  ;;  %v2028_v55 = vld [vmem:[%s2134_s24 + $0x1b4] sm:$0xf0]  ;;  %v1742_v58 = vor.u32 %v2012_v53, %v1741_v52  ;;  %v1978_v60 = vld [vmem:[%s2134_s24 + $0x24] sm:$0xf0] }
  0x1e   : > { %969 = vmatpush.bf16.msra.mxu3 %v1822_v38  ;;  %v1669_v61 = vld [vmem:[%s2134_s24 + $0xa0] sm:$0xf]  ;;  %v1806_v62 = vor.u32 %v2028_v55, %v1805_v54  ;;  %v1994_v63 = vld [vmem:[%s2134_s24 + $0xa4] sm:$0xf0]  ;;  %v1606_v4 = vor.u32 %v1978_v60, %v1605_v59  ;;  %v1597_v7 = vld [vmem:[%s2134_s24 + $0x10] sm:$0xf] }
  0x1f   : > { %931 = vmatpush.bf16.msra.mxu0 %v1622_v44  ;;  %v1733_v0 = vld [vmem:[%s2134_s24 + $0x120] sm:$0xf]  ;;  %v2010_v1 = vld [vmem:[%s2134_s24 + $0x124] sm:$0xf0]  ;;  %v1670_v5 = vor.u32 %v1994_v63, %v1669_v61  ;;  %v1976_v8 = vld [vmem:[%s2134_s24 + $0x14] sm:$0xf0] }
  0x20   : > { %944 = vmatpush.bf16.msra.mxu1 %v1686_v45  ;;  %v1797_v2 = vld [vmem:[%s2134_s24 + $0x1a0] sm:$0xf]  ;;  %v2026_v3 = vld [vmem:[%s2134_s24 + $0x1a4] sm:$0xf0]  ;;  %v1734_v6 = vor.u32 %v2010_v1, %v1733_v0  ;;  %v1661_v9 = vld [vmem:[%s2134_s24 + $0x90] sm:$0xf]  ;;  %v1598_v16 = vor.u32 %v1976_v8, %v1597_v7 }
  0x21   : > { %957 = vmatpush.bf16.msra.mxu2 %v1750_v46  ;;  %v1798_v10 = vor.u32 %v2026_v3, %v1797_v2  ;;  %v1992_v11 = vld [vmem:[%s2134_s24 + $0x94] sm:$0xf0]  ;;  %v1725_v12 = vld [vmem:[%s2134_s24 + $0x110] sm:$0xf]  ;;  %v1589_v17 = vld [vmem:[%s2134_s24] sm:$0xf] }
  0x22   : > { %970 = vmatpush.bf16.msra.mxu3 %v1814_v50  ;;  %v2008_v13 = vld [vmem:[%s2134_s24 + $0x114] sm:$0xf0]  ;;  %v1789_v14 = vld [vmem:[%s2134_s24 + $0x190] sm:$0xf]  ;;  %v1974_v18 = vld [vmem:[%s2134_s24 + $0x4] sm:$0xf0]  ;;  %v1662_v19 = vor.u32 %v1992_v11, %v1661_v9 }
  0x23   : > { %932 = vmatpush.bf16.msra.mxu0 %v1614_v56  ;;  %v2024_v15 = vld [vmem:[%s2134_s24 + $0x194] sm:$0xf0]  ;;  %v1726_v20 = vor.u32 %v2008_v13, %v1725_v12  ;;  %v1653_v21 = vld [vmem:[%s2134_s24 + $0x80] sm:$0xf]  ;;  %v1990_v22 = vld [vmem:[%s2134_s24 + $0x84] sm:$0xf0]  ;;  %v1590_v31 = vor.u32 %v1974_v18, %v1589_v17 }
  0x24   : > { %945 = vmatpush.bf16.msra.mxu1 %v1678_v57  ;;  %v1717_v23 = vld [vmem:[%s2134_s24 + $0x100] sm:$0xf]  ;;  %v1790_v24 = vor.u32 %v2024_v15, %v1789_v14  ;;  %v2006_v25 = vld [vmem:[%s2134_s24 + $0x104] sm:$0xf0]  ;;  %v1901_v28 = vld [vmem:[%s2134_s24 + $0x270] sm:$0xf]  ;;  %v1654_v35 = vor.u32 %v1990_v22, %v1653_v21 }
  0x25   : > { %958 = vmatpush.bf16.msra.mxu2 %v1742_v58  ;;  %v1781_v26 = vld [vmem:[%s2134_s24 + $0x180] sm:$0xf]  ;;  %v2022_v27 = vld [vmem:[%s2134_s24 + $0x184] sm:$0xf0]  ;;  %v2052_v29 = vld [vmem:[%s2134_s24 + $0x274] sm:$0xf0]  ;;  %v1718_v36 = vor.u32 %v2006_v25, %v1717_v23 }
  0x26   : > { %971 = vmatpush.bf16.msra.mxu3 %v1806_v62  ;;  %v1965_v30 = vld [vmem:[%s2134_s24 + $0x2f0] sm:$0xf]  ;;  %v2068_v32 = vld [vmem:[%s2134_s24 + $0x2f4] sm:$0xf0]  ;;  %v1987_v33 = vld [vmem:[%s2134_s24 + $0x74] sm:$0xf]  ;;  %v1782_v39 = vor.u32 %v2022_v27, %v1781_v26  ;;  %v1902_v40 = vor.u32 %v2052_v29, %v1901_v28 }
  0x27   : > { %933 = vmatpush.bf16.msra.mxu0 %v1606_v4  ;;  %v1647_v34 = vld [vmem:[%s2134_s24 + $0x78] sm:$0xf0]  ;;  %v2003_v37 = vld [vmem:[%s2134_s24 + $0xf4] sm:$0xf]  ;;  %v1966_v41 = vor.u32 %v2068_v32, %v1965_v30  ;;  %v1893_v43 = vld [vmem:[%s2134_s24 + $0x260] sm:$0xf] }
  0x28   : > { %946 = vmatpush.bf16.msra.mxu1 %v1670_v5  ;;  %v1711_v38 = vld [vmem:[%s2134_s24 + $0xf8] sm:$0xf0]  ;;  %v1650_v42 = vor.u32 %v1987_v33, %v1647_v34  ;;  %v2050_v44 = vld [vmem:[%s2134_s24 + $0x264] sm:$0xf0]  ;;  %v1957_v45 = vld [vmem:[%s2134_s24 + $0x2e0] sm:$0xf] }
  0x29   : > { %959 = vmatpush.bf16.msra.mxu2 %v1734_v6  ;;  %v1714_v46 = vor.u32 %v2003_v37, %v1711_v38  ;;  %v2066_v47 = vld [vmem:[%s2134_s24 + $0x2e4] sm:$0xf0]  ;;  %v1985_v48 = vld [vmem:[%s2134_s24 + $0x64] sm:$0xf]  ;;  %v1639_v49 = vld [vmem:[%s2134_s24 + $0x68] sm:$0xf0]  ;;  %v1894_v53 = vor.u32 %v2050_v44, %v1893_v43 }
  0x2a   : > { %972 = vmatpush.bf16.msra.mxu3 %v1798_v10  ;;  %v2001_v50 = vld [vmem:[%s2134_s24 + $0xe4] sm:$0xf]  ;;  %v1703_v51 = vld [vmem:[%s2134_s24 + $0xe8] sm:$0xf0]  ;;  %v1958_v54 = vor.u32 %v2066_v47, %v1957_v45  ;;  %v1642_v55 = vor.u32 %v1985_v48, %v1639_v49  ;;  %v1885_v56 = vld [vmem:[%s2134_s24 + $0x250] sm:$0xf] }
  0x2b   : > { %934 = vmatpush.bf16.msra.mxu0 %v1598_v16  ;;  %v226_v52 = vld [vmem:[%s2882_s1] sm:$0x3f]  ;;  %v2048_v57 = vld [vmem:[%s2134_s24 + $0x254] sm:$0xf0]  ;;  %v1949_v58 = vld [vmem:[%s2134_s24 + $0x2d0] sm:$0xf]  ;;  %v1706_v59 = vor.u32 %v2001_v50, %v1703_v51 }
  0x2c   : > { %947 = vmatpush.bf16.msra.mxu1 %v1662_v19  ;;  %435 = vst [vmem:[#allocation1] ss:$9 sm:$0xff] %v226_v52  ;;  %v2064_v60 = vld [vmem:[%s2134_s24 + $0x2d4] sm:$0xf0]  ;;  %v1983_v61 = vld [vmem:[%s2134_s24 + $0x54] sm:$0xf]  ;;  %v1886_v1 = vor.u32 %v2048_v57, %v1885_v56 }
  0x2d   : > { %960 = vmatpush.bf16.msra.mxu2 %v1726_v20  ;;  %v1631_v62 = vld [vmem:[%s2134_s24 + $0x58] sm:$0xf0]  ;;  %v1999_v63 = vld [vmem:[%s2134_s24 + $0xd4] sm:$0xf]  ;;  %v1877_v2 = vld [vmem:[%s2134_s24 + $0x240] sm:$0xf]  ;;  %v1950_v3 = vor.u32 %v2064_v60, %v1949_v58 }
  0x2e   : > { %973 = vmatpush.bf16.msra.mxu3 %v1790_v24  ;;  %v1695_v0 = vld [vmem:[%s2134_s24 + $0xd8] sm:$0xf0]  ;;  %v1634_v4 = vor.u32 %v1983_v61, %v1631_v62  ;;  %v2046_v5 = vld [vmem:[%s2134_s24 + $0x244] sm:$0xf0]  ;;  %v1941_v6 = vld [vmem:[%s2134_s24 + $0x2c0] sm:$0xf] }
  0x2f   : > { %935 = vmatpush.bf16.msra.mxu0 %v1590_v31  ;;  %v2062_v7 = vld [vmem:[%s2134_s24 + $0x2c4] sm:$0xf0]  ;;  %v1698_v8 = vor.u32 %v1999_v63, %v1695_v0  ;;  %v1981_v9 = vld [vmem:[%s2134_s24 + $0x44] sm:$0xf]  ;;  %v1623_v10 = vld [vmem:[%s2134_s24 + $0x48] sm:$0xf0]  ;;  %v1878_v15 = vor.u32 %v2046_v5, %v1877_v2 }
  0x30   : > { %948 = vmatpush.bf16.msra.mxu1 %v1654_v35  ;;  %v1997_v11 = vld [vmem:[%s2134_s24 + $0xc4] sm:$0xf]  ;;  %v1687_v12 = vld [vmem:[%s2134_s24 + $0xc8] sm:$0xf0]  ;;  %v1942_v18 = vor.u32 %v2062_v7, %v1941_v6  ;;  %v1626_v19 = vor.u32 %v1981_v9, %v1623_v10  ;;  %v1869_v20 = vld [vmem:[%s2134_s24 + $0x230] sm:$0xf] }
  0x31   : > { %961 = vmatpush.bf16.msra.mxu2 %v1718_v36  ;;  %v2044_v21 = vld [vmem:[%s2134_s24 + $0x234] sm:$0xf0]  ;;  %v1933_v22 = vld [vmem:[%s2134_s24 + $0x2b0] sm:$0xf]  ;;  %v1690_v23 = vor.u32 %v1997_v11, %v1687_v12  ;;  %v1979_v25 = vld [vmem:[%s2134_s24 + $0x34] sm:$0xf] }
  0x32   : > { %974 = vmatpush.bf16.msra.mxu3 %v1782_v39  ;;  %v2060_v24 = vld [vmem:[%s2134_s24 + $0x2b4] sm:$0xf0]  ;;  %v1615_v26 = vld [vmem:[%s2134_s24 + $0x38] sm:$0xf0]  ;;  %v1995_v27 = vld [vmem:[%s2134_s24 + $0xb4] sm:$0xf]  ;;  %v1870_v29 = vor.u32 %v2044_v21, %v1869_v20 }
  0x33   : > { %980 = vmatpush.bf16.msrb.mxu0 %v1902_v40  ;;  %v2235_v13 = vld [vmem:[#allocation1] sm:$0xff]  ;;  %v2237_v14 = vld [vmem:[#allocation1 + $0x9] sm:$0xff]  ;;  %v2240_v16 = vld [vmem:[#allocation1 + $0x12] sm:$0xff]  ;;  %v1934_v30 = vor.u32 %v2060_v24, %v1933_v22  ;;  %v1618_v31 = vor.u32 %v1979_v25, %v1615_v26 }
  0x34   : > { %993 = vmatpush.bf16.msrb.mxu1 %v1966_v41  ;;  %v2242_v17 = vld [vmem:[#allocation1 + $0x1b] sm:$0xff]  ;;  %936 = vmatmul.bf16.vlgmr.msra.gmra.mxu0 %v2235_v13  ;;  %v2042_v33 = vld [vmem:[%s2134_s24 + $0x224] sm:$0xf0]  ;;  %v1977_v37 = vld [vmem:[%s2134_s24 + $0x24] sm:$0xf] }
  0x35   : > { %1006 = vmatpush.bf16.msrb.mxu2 %v1650_v42  ;;  %949 = vmatmul.bf16.vlgmr.msra.gmra.mxu1 %v2237_v14  ;;  %v1679_v28 = vld [vmem:[%s2134_s24 + $0xb8] sm:$0xf0]  ;;  %v1861_v32 = vld [vmem:[%s2134_s24 + $0x220] sm:$0xf]  ;;  %v2058_v36 = vld [vmem:[%s2134_s24 + $0x2a4] sm:$0xf0] }
  0x36   : > { %1019 = vmatpush.bf16.msrb.mxu3 %v1714_v46  ;;  %962 = vmatmul.bf16.vlgmr.msra.gmra.mxu2 %v2240_v16  ;;  %v1925_v34 = vld [vmem:[%s2134_s24 + $0x2a0] sm:$0xf]  ;;  %v1682_v35 = vor.u32 %v1995_v27, %v1679_v28  ;;  %v1607_v38 = vld [vmem:[%s2134_s24 + $0x28] sm:$0xf0]  ;;  %v1993_v39 = vld [vmem:[%s2134_s24 + $0xa4] sm:$0xf]  ;;  %v1862_v41 = vor.u32 %v2042_v33, %v1861_v32 }
  0x37   : > { %981 = vmatpush.bf16.msrb.mxu0 %v1894_v53  ;;  %975 = vmatmul.bf16.vlgmr.msra.gmra.mxu3 %v2242_v17  ;;  %v1671_v40 = vld [vmem:[%s2134_s24 + $0xa8] sm:$0xf0]  ;;  %v1926_v42 = vor.u32 %v2058_v36, %v1925_v34  ;;  %v1610_v43 = vor.u32 %v1977_v37, %v1607_v38  ;;  %v1853_v44 = vld [vmem:[%s2134_s24 + $0x210] sm:$0xf]  ;;  %v2040_v45 = vld [vmem:[%s2134_s24 + $0x214] sm:$0xf0] }
  0x38   : > { %994 = vmatpush.bf16.msrb.mxu1 %v1958_v54  ;;  %v1917_v46 = vld [vmem:[%s2134_s24 + $0x290] sm:$0xf]  ;;  %v1674_v47 = vor.u32 %v1993_v39, %v1671_v40  ;;  %v2056_v48 = vld [vmem:[%s2134_s24 + $0x294] sm:$0xf0]  ;;  %v1975_v49 = vld [vmem:[%s2134_s24 + $0x14] sm:$0xf]  ;;  %v1854_v53 = vor.u32 %v2040_v45, %v1853_v44 }
  0x39   : > { %1007 = vmatpush.bf16.msrb.mxu2 %v1642_v55  ;;  %v1599_v50 = vld [vmem:[%s2134_s24 + $0x18] sm:$0xf0]  ;;  %v1991_v51 = vld [vmem:[%s2134_s24 + $0x94] sm:$0xf]  ;;  %v1845_v54 = vld [vmem:[%s2134_s24 + $0x200] sm:$0xf]  ;;  %v1918_v56 = vor.u32 %v2056_v48, %v1917_v46 }
  0x3a   : > { %1020 = vmatpush.bf16.msrb.mxu3 %v1706_v59  ;;  %v1663_v52 = vld [vmem:[%s2134_s24 + $0x98] sm:$0xf0]  ;;  %v2038_v55 = vld [vmem:[%s2134_s24 + $0x204] sm:$0xf0]  ;;  %v1602_v57 = vor.u32 %v1975_v49, %v1599_v50  ;;  %v1909_v58 = vld [vmem:[%s2134_s24 + $0x280] sm:$0xf] }
  0x3b   : > { %982 = vmatpush.bf16.msrb.mxu0 %v1886_v1  ;;  %v2054_v59 = vld [vmem:[%s2134_s24 + $0x284] sm:$0xf0]  ;;  %v1973_v60 = vld [vmem:[%s2134_s24 + $0x4] sm:$0xf]  ;;  %v1666_v61 = vor.u32 %v1991_v51, %v1663_v52  ;;  %v1591_v62 = vld [vmem:[%s2134_s24 + $0x8] sm:$0xf0] }
  0x3c   : > { %995 = vmatpush.bf16.msrb.mxu1 %v1950_v3  ;;  %v1989_v63 = vld [vmem:[%s2134_s24 + $0x84] sm:$0xf]  ;;  %v1655_v0 = vld [vmem:[%s2134_s24 + $0x88] sm:$0xf0]  ;;  %v2019_v1 = vld [vmem:[%s2134_s24 + $0x174] sm:$0xf]  ;;  %v1594_v9 = vor.u32 %v1973_v60, %v1591_v62 }
  0x3d   : > { %1008 = vmatpush.bf16.msrb.mxu2 %v1634_v4  ;;  %v1775_v2 = vld [vmem:[%s2134_s24 + $0x178] sm:$0xf0]  ;;  %v2035_v3 = vld [vmem:[%s2134_s24 + $0x1f4] sm:$0xf]  ;;  %v1846_v4 = vor.u32 %v2038_v55, %v1845_v54  ;;  %v1658_v12 = vor.u32 %v1989_v63, %v1655_v0  ;;  %v2017_v20 = vld [vmem:[%s2134_s24 + $0x164] sm:$0xf] }
  0x3e   : > { %1021 = vmatpush.bf16.msrb.mxu3 %v1698_v8  ;;  %v1839_v5 = vld [vmem:[%s2134_s24 + $0x1f8] sm:$0xf0]  ;;  %v2051_v6 = vld [vmem:[%s2134_s24 + $0x274] sm:$0xf]  ;;  %v1910_v8 = vor.u32 %v2054_v59, %v1909_v58  ;;  %v1767_v21 = vld [vmem:[%s2134_s24 + $0x168] sm:$0xf0] }
  0x3f   : > { %983 = vmatpush.bf16.msrb.mxu0 %v1878_v15  ;;  %v1903_v7 = vld [vmem:[%s2134_s24 + $0x278] sm:$0xf0]  ;;  %v2067_v10 = vld [vmem:[%s2134_s24 + $0x2f4] sm:$0xf]  ;;  %v1778_v15 = vor.u32 %v2019_v1, %v1775_v2  ;;  %v2033_v22 = vld [vmem:[%s2134_s24 + $0x1e4] sm:$0xf] }
  0x40   : > { %996 = vmatpush.bf16.msrb.mxu1 %v1942_v18  ;;  %v1967_v11 = vld [vmem:[%s2134_s24 + $0x2f8] sm:$0xf0]  ;;  %v1842_v18 = vor.u32 %v2035_v3, %v1839_v5  ;;  %v1831_v24 = vld [vmem:[%s2134_s24 + $0x1e8] sm:$0xf0]  ;;  %v2049_v25 = vld [vmem:[%s2134_s24 + $0x264] sm:$0xf] }
  0x41   : > { %1009 = vmatpush.bf16.msrb.mxu2 %v1626_v19  ;;  %v1906_v19 = vor.u32 %v2051_v6, %v1903_v7  ;;  %v1895_v26 = vld [vmem:[%s2134_s24 + $0x268] sm:$0xf0]  ;;  %v2293_v27 = vld [vmem:[#allocation1 + $0x24] sm:$0xff]  ;;  %v1834_v32 = vor.u32 %v2033_v22, %v1831_v24  ;;  %v2015_v34 = vld [vmem:[%s2134_s24 + $0x154] sm:$0xf] }
  0x42   : > { %1022 = vmatpush.bf16.msrb.mxu3 %v1690_v23  ;;  %v1970_v23 = vor.u32 %v2067_v10, %v1967_v11  ;;  %v2065_v28 = vld [vmem:[%s2134_s24 + $0x2e4] sm:$0xf]  ;;  %v1898_v33 = vor.u32 %v2049_v25, %v1895_v26  ;;  %v2031_v36 = vld [vmem:[%s2134_s24 + $0x1d4] sm:$0xf]  ;;  %v1823_v38 = vld [vmem:[%s2134_s24 + $0x1d8] sm:$0xf0] }
  0x43   : > { %984 = vmatpush.bf16.msrb.mxu0 %v1870_v29  ;;  %v1959_v29 = vld [vmem:[%s2134_s24 + $0x2e8] sm:$0xf0]  ;;  %v2047_v39 = vld [vmem:[%s2134_s24 + $0x254] sm:$0xf]  ;;  %v1887_v40 = vld [vmem:[%s2134_s24 + $0x258] sm:$0xf0]  ;;  %v1826_v44 = vor.u32 %v2031_v36, %v1823_v38 }
  0x44   : > { %997 = vmatpush.bf16.msrb.mxu1 %v1934_v30  ;;  %v2297_v30 = vld [vmem:[#allocation1 + $0x2d] sm:$0xff]  ;;  %v1962_v37 = vor.u32 %v2065_v28, %v1959_v29  ;;  %v1890_v45 = vor.u32 %v2047_v39, %v1887_v40  ;;  %v2013_v46 = vld [vmem:[%s2134_s24 + $0x144] sm:$0xf]  ;;  %v1807_v60 = vld [vmem:[%s2134_s24 + $0x1b8] sm:$0xf0] }
  0x45   : > { %1010 = vmatpush.bf16.msrb.mxu2 %v1618_v31  ;;  %v1770_v31 = vor.u32 %v2017_v20, %v1767_v21  ;;  %v2029_v48 = vld [vmem:[%s2134_s24 + $0x1c4] sm:$0xf]  ;;  %v1815_v49 = vld [vmem:[%s2134_s24 + $0x1c8] sm:$0xf0]  ;;  %v2027_v58 = vld [vmem:[%s2134_s24 + $0x1b4] sm:$0xf] }
  0x46   : > { %1023 = vmatpush.bf16.msrb.mxu3 %v1682_v35  ;;  %v1759_v35 = vld [vmem:[%s2134_s24 + $0x158] sm:$0xf0]  ;;  %v2045_v50 = vld [vmem:[%s2134_s24 + $0x244] sm:$0xf]  ;;  %v1879_v51 = vld [vmem:[%s2134_s24 + $0x248] sm:$0xf0]  ;;  %v1818_v54 = vor.u32 %v2029_v48, %v1815_v49  ;;  %v1810_v2 = vor.u32 %v2027_v58, %v1807_v60 }
  0x47   : > { %985 = vmatpush.bf16.msrb.mxu0 %v1862_v41  ;;  %v2063_v41 = vld [vmem:[%s2134_s24 + $0x2d4] sm:$0xf]  ;;  %v2061_v52 = vld [vmem:[%s2134_s24 + $0x2c4] sm:$0xf]  ;;  %v1882_v55 = vor.u32 %v2045_v50, %v1879_v51  ;;  %v1871_v62 = vld [vmem:[%s2134_s24 + $0x238] sm:$0xf0] }
  0x48   : > { %998 = vmatpush.bf16.msrb.mxu1 %v1926_v42  ;;  %v1951_v42 = vld [vmem:[%s2134_s24 + $0x2d8] sm:$0xf0]  ;;  %v2059_v63 = vld [vmem:[%s2134_s24 + $0x2b4] sm:$0xf]  ;;  %v1735_v5 = vld [vmem:[%s2134_s24 + $0x128] sm:$0xf0] }
  0x49   : > { %1011 = vmatpush.bf16.msrb.mxu2 %v1610_v43  ;;  %v1762_v43 = vor.u32 %v2015_v34, %v1759_v35  ;;  %v1935_v0 = vld [vmem:[%s2134_s24 + $0x2b8] sm:$0xf0]  ;;  %v2025_v6 = vld [vmem:[%s2134_s24 + $0x1a4] sm:$0xf]  ;;  %v1863_v10 = vld [vmem:[%s2134_s24 + $0x228] sm:$0xf0] }
  0x4a   : > { %1024 = vmatpush.bf16.msrb.mxu3 %v1674_v47  ;;  %v1751_v47 = vld [vmem:[%s2134_s24 + $0x148] sm:$0xf0]  ;;  %v1938_v7 = vor.u32 %v2059_v63, %v1935_v0  ;;  %v2057_v11 = vld [vmem:[%s2134_s24 + $0x2a4] sm:$0xf]  ;;  %v2007_v20 = vld [vmem:[%s2134_s24 + $0x114] sm:$0xf] }
  0x4b   : > { %986 = vmatpush.bf16.msrb.mxu0 %v1854_v53  ;;  %v1754_v53 = vor.u32 %v2013_v46, %v1751_v47  ;;  %v1727_v21 = vld [vmem:[%s2134_s24 + $0x118] sm:$0xf0]  ;;  %v2023_v22 = vld [vmem:[%s2134_s24 + $0x194] sm:$0xf]  ;;  %v2005_v34 = vld [vmem:[%s2134_s24 + $0x104] sm:$0xf] }
  0x4c   : > { %999 = vmatpush.bf16.msrb.mxu1 %v1918_v56  ;;  %v2011_v56 = vld [vmem:[%s2134_s24 + $0x134] sm:$0xf]  ;;  %v1791_v24 = vld [vmem:[%s2134_s24 + $0x198] sm:$0xf0]  ;;  %v1719_v35 = vld [vmem:[%s2134_s24 + $0x108] sm:$0xf0] }
  0x4d   : > { %1012 = vmatpush.bf16.msrb.mxu2 %v1602_v57  ;;  %v1743_v57 = vld [vmem:[%s2134_s24 + $0x138] sm:$0xf0]  ;;  %v2039_v25 = vld [vmem:[%s2134_s24 + $0x214] sm:$0xf]  ;;  %v2021_v36 = vld [vmem:[%s2134_s24 + $0x184] sm:$0xf] }
  0x4e   : > { %1025 = vmatpush.bf16.msrb.mxu3 %v1666_v61  ;;  %v2043_v61 = vld [vmem:[%s2134_s24 + $0x234] sm:$0xf]  ;;  %v1746_v1 = vor.u32 %v2011_v56, %v1743_v57  ;;  %v1855_v26 = vld [vmem:[%s2134_s24 + $0x218] sm:$0xf0]  ;;  %v1783_v38 = vld [vmem:[%s2134_s24 + $0x188] sm:$0xf0] }
  0x4f   : > { %987 = vmatpush.bf16.msrb.mxu0 %v1846_v4  ;;  %v1874_v3 = vor.u32 %v2043_v61, %v1871_v62  ;;  %v2009_v4 = vld [vmem:[%s2134_s24 + $0x124] sm:$0xf]  ;;  %v2055_v28 = vld [vmem:[%s2134_s24 + $0x294] sm:$0xf]  ;;  %v1919_v29 = vld [vmem:[%s2134_s24 + $0x298] sm:$0xf0] }
  0x50   : > { %1000 = vmatpush.bf16.msrb.mxu1 %v1910_v8  ;;  %v1799_v8 = vld [vmem:[%s2134_s24 + $0x1a8] sm:$0xf0]  ;;  %v2037_v39 = vld [vmem:[%s2134_s24 + $0x204] sm:$0xf]  ;;  %v303_v47 = vld [vmem:[%s2884_s3 + $0xf0] sm:$0xff] }
  0x51   : > { %1013 = vmatpush.bf16.msrb.mxu2 %v1594_v9  ;;  %v2041_v9 = vld [vmem:[%s2134_s24 + $0x224] sm:$0xf]  ;;  %v1847_v40 = vld [vmem:[%s2134_s24 + $0x208] sm:$0xf0]  ;;  %v304_v48 = vld [vmem:[%s2884_s3 + $0xf8] sm:$0xff] }
  0x52   : > { %1026 = vmatpush.bf16.msrb.mxu3 %v1658_v12  ;;  %988 = vmatmul.bf16.vlgmr.msrb.gmra.mxu0 %v2293_v27  ;;  %v1927_v12 = vld [vmem:[%s2134_s24 + $0x2a8] sm:$0xf0]  ;;  %v299_v50 = vld [vmem:[%s2884_s3 + $0xd0] sm:$0xff]  ;;  %v296_v51 = vld [vmem:[%s2884_s3 + $0xb8] sm:$0xff] }
  0x53   : > { %1032 = vmatpush.bf16.msra.mxu0 %v1778_v15  ;;  %1001 = vmatmul.bf16.vlgmr.msrb.gmra.mxu1 %v2297_v30  ;;  %v1738_v15 = vor.u32 %v2009_v4, %v1735_v5  ;;  %v302_v49 = vld [vmem:[%s2884_s3 + $0xe8] sm:$0xff]  ;;  %v287_v57 = vld [vmem:[%s2884_s3 + $0x70] sm:$0xff]  ;;  %v288_v58 = vld [vmem:[%s2884_s3 + $0x78] sm:$0xff] }
  0x54   : > { %1045 = vmatpush.bf16.msra.mxu1 %v1842_v18  ;;  %1014 = vmatmul.bf16.vlgmr.msrb.gmra.mxu2 %v2235_v13  ;;  %v1954_v13 = vor.u32 %v2063_v41, %v1951_v42  ;;  %v1802_v18 = vor.u32 %v2025_v6, %v1799_v8  ;;  %v2053_v41 = vld [vmem:[%s2134_s24 + $0x284] sm:$0xf]  ;;  %v1911_v42 = vld [vmem:[%s2134_s24 + $0x288] sm:$0xf0]  ;;  %v283_v61 = vld [vmem:[%s2884_s3 + $0x50] sm:$0xff] }
  0x55   : > { %1058 = vmatpush.bf16.msra.mxu2 %v1906_v19  ;;  %1027 = vmatmul.bf16.vlgmr.msrb.gmra.mxu3 %v2237_v14  ;;  %v1943_v14 = vld [vmem:[%s2134_s24 + $0x2c8] sm:$0xf0]  ;;  %v1866_v19 = vor.u32 %v2041_v9, %v1863_v10  ;;  %v1914_v46 = vor.u32 %v2053_v41, %v1911_v42  ;;  %v284_v62 = vld [vmem:[%s2884_s3 + $0x58] sm:$0xff]  ;;  %v281_v63 = vld [vmem:[%s2884_s3 + $0x40] sm:$0xff] }
  0x56   : > { %1071 = vmatpush.bf16.msra.mxu3 %v1970_v23  ;;  %v1946_v59 = vor.u32 %v2061_v52, %v1943_v14  ;;  %v1930_v23 = vor.u32 %v2057_v11, %v1927_v12  ;;  %v293_v52 = vld [vmem:[%s2884_s3 + $0xa0] sm:$0xff]  ;;  %v294_v14 = vld [vmem:[%s2884_s3 + $0xa8] sm:$0xff]  ;;  %v275_v5 = vld [vmem:[%s2884_s3 + $0x10] sm:$0xff] }
  0x57   : > { %1033 = vmatpush.bf16.msra.mxu0 %v1770_v31  ;;  %v1730_v31 = vor.u32 %v2007_v20, %v1727_v21  ;;  %v290_v56 = vld [vmem:[%s2884_s3 + $0x88] sm:$0xff]  ;;  %v276_v6 = vld [vmem:[%s2884_s3 + $0x18] sm:$0xff]  ;;  %v335_v10 = vld [vmem:[%s2884_s3 + $0x1f0] sm:$0xff] }
  0x58   : > { %1046 = vmatpush.bf16.msra.mxu1 %v1834_v32  ;;  %v1794_v32 = vor.u32 %v2023_v22, %v1791_v24  ;;  %v286_v60 = vld [vmem:[%s2884_s3 + $0x68] sm:$0xff]  ;;  %v336_v11 = vld [vmem:[%s2884_s3 + $0x1f8] sm:$0xff]  ;;  %v331_v22 = vld [vmem:[%s2884_s3 + $0x1d0] sm:$0xff] }
  0x59   : > { %1059 = vmatpush.bf16.msra.mxu2 %v1898_v33  ;;  %v1858_v33 = vor.u32 %v2039_v25, %v1855_v26  ;;  %v282_v0 = vld [vmem:[%s2884_s3 + $0x48] sm:$0xff]  ;;  %v329_v24 = vld [vmem:[%s2884_s3 + $0x1c0] sm:$0xff]  ;;  %v319_v42 = vld [vmem:[%s2884_s3 + $0x170] sm:$0xff] }
  0x5a   : > { %1072 = vmatpush.bf16.msra.mxu3 %v1962_v37  ;;  %v1922_v37 = vor.u32 %v2055_v28, %v1919_v29  ;;  %v278_v4 = vld [vmem:[%s2884_s3 + $0x28] sm:$0xff]  ;;  %v327_v28 = vld [vmem:[%s2884_s3 + $0x1b0] sm:$0xff]  ;;  %v328_v29 = vld [vmem:[%s2884_s3 + $0x1b8] sm:$0xff] }
  0x5b   : > { %1034 = vmatpush.bf16.msra.mxu0 %v1762_v43  ;;  %v1722_v43 = vor.u32 %v2005_v34, %v1719_v35  ;;  %v274_v8 = vld [vmem:[%s2884_s3 + $0x8] sm:$0xff] }
  0x5c   : > { %1047 = vmatpush.bf16.msra.mxu1 %v1826_v44  ;;  %v1786_v44 = vor.u32 %v2021_v36, %v1783_v38  ;;  %v330_v26 = vld [vmem:[%s2884_s3 + $0x1c8] sm:$0xff]  ;;  %v324_v38 = vld [vmem:[%s2884_s3 + $0x198] sm:$0xff] }
  0x5d   : > { %1060 = vmatpush.bf16.msra.mxu2 %v1890_v45  ;;  %v1850_v45 = vor.u32 %v2037_v39, %v1847_v40  ;;  %v321_v39 = vld [vmem:[%s2884_s3 + $0x180] sm:$0xff]  ;;  %v322_v40 = vld [vmem:[%s2884_s3 + $0x188] sm:$0xff] }
  0x5e   : > { %1073 = vmatpush.bf16.msra.mxu3 %v1954_v13  ;;  %v301_v13 = vld [vmem:[%s2884_s3 + $0xe0] sm:$0xff] }
  0x5f   : > { %1035 = vmatpush.bf16.msra.mxu0 %v1754_v53  ;;  %v291_v53 = vld [vmem:[%s2884_s3 + $0x90] sm:$0xff] }
  0x60   : > { %1048 = vmatpush.bf16.msra.mxu1 %v1818_v54  ;;  %v292_v54 = vld [vmem:[%s2884_s3 + $0x98] sm:$0xff] }
  0x61   : > { %1061 = vmatpush.bf16.msra.mxu2 %v1882_v55  ;;  %v289_v55 = vld [vmem:[%s2884_s3 + $0x80] sm:$0xff] }
  0x62   : > { %1074 = vmatpush.bf16.msra.mxu3 %v1946_v59  ;;  %v285_v59 = vld [vmem:[%s2884_s3 + $0x60] sm:$0xff] }
  0x63   : > { %1036 = vmatpush.bf16.msra.mxu0 %v1746_v1  ;;  %v279_v1 = vld [vmem:[%s2884_s3 + $0x30] sm:$0xff] }
  0x64   : > { %1049 = vmatpush.bf16.msra.mxu1 %v1810_v2  ;;  %v280_v2 = vld [vmem:[%s2884_s3 + $0x38] sm:$0xff] }
  0x65   : > { %1062 = vmatpush.bf16.msra.mxu2 %v1874_v3  ;;  %v277_v3 = vld [vmem:[%s2884_s3 + $0x20] sm:$0xff] }
  0x66   : > { %1075 = vmatpush.bf16.msra.mxu3 %v1938_v7  ;;  %v273_v7 = vld [vmem:[%s2884_s3] sm:$0xff] }
  0x67   : > { %1037 = vmatpush.bf16.msra.mxu0 %v1738_v15  ;;  %v333_v15 = vld [vmem:[%s2884_s3 + $0x1e0] sm:$0xff] }
  0x68   : > { %1050 = vmatpush.bf16.msra.mxu1 %v1802_v18  ;;  %v334_v18 = vld [vmem:[%s2884_s3 + $0x1e8] sm:$0xff] }
  0x69   : > { %1063 = vmatpush.bf16.msra.mxu2 %v1866_v19 }
  0x6a   : > { %1076 = vmatpush.bf16.msra.mxu3 %v1930_v23  ;;  %v332_v23 = vld [vmem:[%s2884_s3 + $0x1d8] sm:$0xff] }
  0x6b   : > { %1038 = vmatpush.bf16.msra.mxu0 %v1730_v31 }
  0x6c   : > { %1051 = vmatpush.bf16.msra.mxu1 %v1794_v32  ;;  %v325_v32 = vld [vmem:[%s2884_s3 + $0x1a0] sm:$0xff] }
  0x6d   : > { %1064 = vmatpush.bf16.msra.mxu2 %v1858_v33  ;;  %v326_v33 = vld [vmem:[%s2884_s3 + $0x1a8] sm:$0xff] }
  0x6e   : > { %1077 = vmatpush.bf16.msra.mxu3 %v1922_v37  ;;  %v323_v37 = vld [vmem:[%s2884_s3 + $0x190] sm:$0xff] }
  0x6f   : > { %1039 = vmatpush.bf16.msra.mxu0 %v1722_v43  ;;  %v320_v43 = vld [vmem:[%s2884_s3 + $0x178] sm:$0xff] }
  0x70   : > { %1052 = vmatpush.bf16.msra.mxu1 %v1786_v44 }
  0x71   : > { %1065 = vmatpush.bf16.msra.mxu2 %v1850_v45  ;;  %v317_v45 = vld [vmem:[%s2884_s3 + $0x160] sm:$0xff] }
  0x72   : > { %1078 = vmatpush.bf16.msra.mxu3 %v1914_v46  ;;  %1040 = vmatmul.bf16.vlgmr.msra.gmra.mxu0 %v2240_v16  ;;  %v300_v16 = vld [vmem:[%s2884_s3 + $0xd8] sm:$0xff]  ;;  %v318_v46 = vld [vmem:[%s2884_s3 + $0x168] sm:$0xff] }
  0x73   : > { %1133 = vmatpush.msrb.mxu0 %v303_v47  ;;  %1053 = vmatmul.bf16.vlgmr.msra.gmra.mxu1 %v2242_v17  ;;  %v297_v17 = vld [vmem:[%s2884_s3 + $0xc0] sm:$0xff] }
  0x74   : > { %1066 = vmatmul.bf16.vlgmr.msra.gmra.mxu2 %v2293_v27  ;;  %v298_v27 = vld [vmem:[%s2884_s3 + $0xc8] sm:$0xff]  ;;  %1219 = vmatpush.msrb.mxu1 %v335_v10 }
  0x75   : > { %1305 = vmatpush.msrb.mxu2 %v304_v48  ;;  %1079 = vmatmul.bf16.vlgmr.msra.gmra.mxu3 %v2297_v30  ;;  %v295_v30 = vld [vmem:[%s2884_s3 + $0xb0] sm:$0xff] }
  0x76   : > { %1134 = vmatpush.msrb.mxu0 %v301_v13  ;;  %1391 = vmatpush.msrb.mxu3 %v336_v11  ;;  %v315_v13 = vld [vmem:[%s2884_s3 + $0x150] sm:$0xff] }
  0x77   : > { %1306 = vmatpush.msrb.mxu2 %v302_v49  ;;  %1220 = vmatpush.msrb.mxu1 %v333_v15  ;;  %v316_v49 = vld [vmem:[%s2884_s3 + $0x158] sm:$0xff]  ;;  %v235_v15 = vld [vmem:[%s2883_s2 + $0x40] sm:$0xff] }
  0x78   : > { %1135 = vmatpush.msrb.mxu0 %v299_v50  ;;  %1392 = vmatpush.msrb.mxu3 %v334_v18 }
  0x79   : > { %1307 = vmatpush.msrb.mxu2 %v300_v16  ;;  %1221 = vmatpush.msrb.mxu1 %v331_v22  ;;  %v227_v16 = vld [vmem:[%s2883_s2] sm:$0xff] }
  0x7a   : > { %1136 = vmatpush.msrb.mxu0 %v297_v17  ;;  %1393 = vmatpush.msrb.mxu3 %v332_v23  ;;  %v313_v17 = vld [vmem:[%s2884_s3 + $0x140] sm:$0xff] }
  0x7b   : > { %1308 = vmatpush.msrb.mxu2 %v298_v27  ;;  %1222 = vmatpush.msrb.mxu1 %v329_v24  ;;  %v314_v27 = vld [vmem:[%s2884_s3 + $0x148] sm:$0xff] }
  0x7c   : > { %1137 = vmatpush.msrb.mxu0 %v295_v30  ;;  %1394 = vmatpush.msrb.mxu3 %v330_v26  ;;  %v228_v24 = vld [vmem:[%s2883_s2 + $0x8] sm:$0xff] }
  0x7d   : > { %1309 = vmatpush.msrb.mxu2 %v296_v51  ;;  %1223 = vmatpush.msrb.mxu1 %v327_v28  ;;  %v311_v51 = vld [vmem:[%s2884_s3 + $0x130] sm:$0xff] }
  0x7e   : > { %1138 = vmatpush.msrb.mxu0 %v293_v52  ;;  %1395 = vmatpush.msrb.mxu3 %v328_v29  ;;  %v312_v52 = vld [vmem:[%s2884_s3 + $0x138] sm:$0xff]  ;;  %v237_v29 = vld [vmem:[%s2883_s2 + $0x50] sm:$0xff] }
  0x7f   : > { %1310 = vmatpush.msrb.mxu2 %v294_v14  ;;  %1224 = vmatpush.msrb.mxu1 %v325_v32 }
  0x80   : > { %1139 = vmatpush.msrb.mxu0 %v291_v53  ;;  %1396 = vmatpush.msrb.mxu3 %v326_v33  ;;  %v230_v33 = vld [vmem:[%s2883_s2 + $0x18] sm:$0xff] }
  0x81   : > { %1311 = vmatpush.msrb.mxu2 %v292_v54  ;;  %1225 = vmatpush.msrb.mxu1 %v323_v37  ;;  %v232_v37 = vld [vmem:[%s2883_s2 + $0x28] sm:$0xff] }
  0x82   : > { %1140 = vmatpush.msrb.mxu0 %v289_v55  ;;  %1397 = vmatpush.msrb.mxu3 %v324_v38 }
  0x83   : > { %1312 = vmatpush.msrb.mxu2 %v290_v56  ;;  %1226 = vmatpush.msrb.mxu1 %v321_v39  ;;  %v309_v56 = vld [vmem:[%s2884_s3 + $0x120] sm:$0xff]  ;;  %v241_v39 = vld [vmem:[%s2883_s2 + $0x70] sm:$0xff] }
  0x84   : > { %1141 = vmatpush.msrb.mxu0 %v287_v57  ;;  %1398 = vmatpush.msrb.mxu3 %v322_v40  ;;  %v310_v57 = vld [vmem:[%s2884_s3 + $0x128] sm:$0xff] }
  0x85   : > { %1313 = vmatpush.msrb.mxu2 %v288_v58  ;;  %1227 = vmatpush.msrb.mxu1 %v319_v42 }
  0x86   : > { %1142 = vmatpush.msrb.mxu0 %v285_v59  ;;  %1399 = vmatpush.msrb.mxu3 %v320_v43  ;;  %v307_v59 = vld [vmem:[%s2884_s3 + $0x110] sm:$0xff]  ;;  %v243_v43 = vld [vmem:[%s2883_s2 + $0x80] sm:$0xff] }
  0x87   : > { %1314 = vmatpush.msrb.mxu2 %v286_v60  ;;  %1228 = vmatpush.msrb.mxu1 %v317_v45  ;;  %v308_v60 = vld [vmem:[%s2884_s3 + $0x118] sm:$0xff]  ;;  %v236_v45 = vld [vmem:[%s2883_s2 + $0x48] sm:$0xff] }
  0x88   : > { %1143 = vmatpush.msrb.mxu0 %v283_v61  ;;  %1400 = vmatpush.msrb.mxu3 %v318_v46  ;;  %v229_v61 = vld [vmem:[%s2883_s2 + $0x10] sm:$0xff] }
  0x89   : > { %1315 = vmatpush.msrb.mxu2 %v284_v62  ;;  %1229 = vmatpush.msrb.mxu1 %v315_v13  ;;  %v305_v62 = vld [vmem:[%s2884_s3 + $0x100] sm:$0xff]  ;;  %v238_v13 = vld [vmem:[%s2883_s2 + $0x58] sm:$0xff] }
  0x8a   : > { %1144 = vmatpush.msrb.mxu0 %v281_v63  ;;  %1401 = vmatpush.msrb.mxu3 %v316_v49  ;;  %v306_v63 = vld [vmem:[%s2884_s3 + $0x108] sm:$0xff] }
  0x8b   : > { %1316 = vmatpush.msrb.mxu2 %v282_v0  ;;  %1230 = vmatpush.msrb.mxu1 %v313_v17  ;;  %v240_v17 = vld [vmem:[%s2883_s2 + $0x68] sm:$0xff] }
  0x8c   : > { %1145 = vmatpush.msrb.mxu0 %v279_v1  ;;  %1402 = vmatpush.msrb.mxu3 %v314_v27 }
  0x8d   : > { %1317 = vmatpush.msrb.mxu2 %v280_v2  ;;  %1231 = vmatpush.msrb.mxu1 %v311_v51  ;;  %v249_v51 = vld [vmem:[%s2883_s2 + $0xb0] sm:$0xff] }
  0x8e   : > { %1146 = vmatpush.msrb.mxu0 %v277_v3  ;;  %1403 = vmatpush.msrb.mxu3 %v312_v52  ;;  %v231_v3 = vld [vmem:[%s2883_s2 + $0x20] sm:$0xff] }
  0x8f   : > { %1318 = vmatpush.msrb.mxu2 %v278_v4  ;;  %1232 = vmatpush.msrb.mxu1 %v309_v56  ;;  %v244_v56 = vld [vmem:[%s2883_s2 + $0x88] sm:$0xff] }
  0x90   : > { %1147 = vmatpush.msrb.mxu0 %v275_v5  ;;  %1404 = vmatpush.msrb.mxu3 %v310_v57  ;;  %v233_v5 = vld [vmem:[%s2883_s2 + $0x30] sm:$0xff] }
  0x91   : > { %1319 = vmatpush.msrb.mxu2 %v276_v6  ;;  %1233 = vmatpush.msrb.mxu1 %v307_v59 }
  0x92   : > { %1148 = vmatpush.msrb.mxu0 %v273_v7  ;;  %1405 = vmatpush.msrb.mxu3 %v308_v60  ;;  %v246_v60 = vld [vmem:[%s2883_s2 + $0x98] sm:$0xff] }
  0x93   : > { %1320 = vmatpush.msrb.mxu2 %v274_v8  ;;  %1234 = vmatpush.msrb.mxu1 %v305_v62  ;;  %v255_v62 = vld [vmem:[%s2883_s2 + $0xe0] sm:$0xff] }
  0x94   : > { %1406 = vmatpush.msrb.mxu3 %v306_v63 }
  0xb1   : > { %v937_v12 = vpop.f32.mrf.mxu0 }
  0xb2   : > { %v950_v9 = vpop.f32.mrf.mxu1 }
  0xb3   : > { %v951_v31 = vadd.f32 %v950_v9, %v937_v12 }
  0xb9   : > { %v963_v20 = vpop.f32.mrf.mxu2  ;;  %v939_v25 = vpop.f32.mrf.mxu0 }
  0xba   : > { %v952_v19 = vpop.f32.mrf.mxu1  ;;  %v976_v21 = vpop.f32.mrf.mxu3  ;;  %v964_v34 = vadd.f32 %v963_v20, %v951_v31 }
  0xbc   : > { %v977_v41 = vadd.f32 %v976_v21, %v964_v34 }
  0xc1   : > { %v965_v35 = vpop.f32.mrf.mxu2 }
  0xc2   : > { %v978_v36 = vpop.f32.mrf.mxu3  ;;  %v239_v35 = vld [vmem:[%s2883_s2 + $0x60] sm:$0xff] }
  0xcf   : > { %v989_v44 = vpop.f32.mrf.mxu0 }
  0xd0   : > { %v990_v47 = vadd.f32 %v989_v44, %v977_v41  ;;  %v1002_v48 = vpop.f32.mrf.mxu1  ;;  %v234_v41 = vld [vmem:[%s2883_s2 + $0x38] sm:$0xff] }
  0xd2   : > { %v1003_v50 = vadd.f32 %v1002_v48, %v990_v47  ;;  %v245_v47 = vld [vmem:[%s2883_s2 + $0x90] sm:$0xff] }
  0xd4   : > { %v2526_v30 = vperm.slane %v1003_v50, 0  ;;  %v247_v50 = vld [vmem:[%s2883_s2 + $0xa0] sm:$0xff] }
  0xd6   : > { %v1086_v14 = vmul.f32 %v2526_v30, %v227_v16  ;;  %v1088_v0 = vmul.f32 %v2526_v30, %v229_v61  ;;  %v1090_v4 = vmul.f32 %v2526_v30, %v231_v3  ;;  %v1092_v10 = vmul.f32 %v2526_v30, %v233_v5 }
  0xd7   : > { %v1015_v53 = vpop.f32.mrf.mxu2  ;;  %v991_v55 = vpop.f32.mrf.mxu0  ;;  %v1094_v23 = vmul.f32 %v2526_v30, %v235_v15  ;;  %v1096_v32 = vmul.f32 %v2526_v30, %v237_v29  ;;  %v1098_v36 = vmul.f32 %v2526_v30, %v239_v35  ;;  %v1100_v40 = vmul.f32 %v2526_v30, %v241_v39 }
  0xd8   : > { %v1028_v54 = vpop.f32.mrf.mxu3  ;;  %1149 = vmatmul.f32.vlgmr.msrb.gmra.mxu0 %v1086_v14  ;;  %1321 = vmatmul.f32.vlgmr.msrb.gmra.mxu2 %v1086_v14  ;;  %v1004_v58 = vpop.f32.mrf.mxu1  ;;  %v1102_v44 = vmul.f32 %v2526_v30, %v243_v43  ;;  %v1104_v48 = vmul.f32 %v2526_v30, %v245_v47  ;;  %v1106_v16 = vmul.f32 %v2526_v30, %v247_v50  ;;  %v242_v14 = vld [vmem:[%s2883_s2 + $0x78] sm:$0xff]  ;;  %v269_v47 = vld [vmem:[%s2883_s2 + $0x150] sm:$0xff] }
  0xd9   : > { %v1029_v6 = vadd.f32 %v1028_v54, %v1015_v53  ;;  %v1108_v52 = vmul.f32 %v2526_v30, %v249_v51  ;;  %v251_v54 = vld [vmem:[%s2883_s2 + $0xc0] sm:$0xff]  ;;  %v253_v58 = vld [vmem:[%s2883_s2 + $0xd0] sm:$0xff]  ;;  %v1114_v63 = vmul.f32 %v2526_v30, %v255_v62 }
  0xda   : > { %v1110_v55 = vmul.f32 %v2526_v30, %v251_v54  ;;  %v1112_v59 = vmul.f32 %v2526_v30, %v253_v58  ;;  %v271_v54 = vld [vmem:[%s2883_s2 + $0x160] sm:$0xf] }
  0xdf   : > { %v1017_v1 = vpop.f32.mrf.mxu2 }
  0xe0   : > { %v1030_v2 = vpop.f32.mrf.mxu3  ;;  %1152 = vmatmul.f32.gmra.mxu0 %v1088_v0  ;;  %1324 = vmatmul.f32.gmra.mxu2 %v1088_v0  ;;  %v248_v0 = vld [vmem:[%s2883_s2 + $0xa8] sm:$0xff] }
  0xe1   : > { %v257_v2 = vld [vmem:[%s2883_s2 + $0xf0] sm:$0xff] }
  0xe2   : > { %v1116_v3 = vmul.f32 %v2526_v30, %v257_v2 }
  0xe8   : > { %1155 = vmatmul.f32.gmra.mxu0 %v1090_v4  ;;  %1327 = vmatmul.f32.gmra.mxu2 %v1090_v4  ;;  %v250_v4 = vld [vmem:[%s2883_s2 + $0xb8] sm:$0xff] }
  0xef   : > { %v1041_v7 = vpop.f32.mrf.mxu0 }
  0xf0   : > { %v1054_v8 = vpop.f32.mrf.mxu1  ;;  %v1042_v9 = vadd.f32 %v1041_v7, %v1029_v6  ;;  %1158 = vmatmul.f32.gmra.mxu0 %v1092_v10  ;;  %1330 = vmatmul.f32.gmra.mxu2 %v1092_v10  ;;  %v259_v6 = vld [vmem:[%s2883_s2 + $0x100] sm:$0xff] }
  0xf2   : > { %v1055_v11 = vadd.f32 %v1054_v8, %v1042_v9  ;;  %v1118_v8 = vmul.f32 %v2526_v30, %v259_v6  ;;  %v252_v9 = vld [vmem:[%s2883_s2 + $0xc8] sm:$0xff] }
  0xf7   : > { %v1067_v12 = vpop.f32.mrf.mxu2  ;;  %v1043_v20 = vpop.f32.mrf.mxu0 }
  0xf8   : > { %v1068_v18 = vadd.f32 %v1067_v12, %v1055_v11  ;;  %v1080_v19 = vpop.f32.mrf.mxu3  ;;  %v1056_v21 = vpop.f32.mrf.mxu1  ;;  %1161 = vmatmul.f32.gmra.mxu0 %v1094_v23  ;;  %1333 = vmatmul.f32.gmra.mxu2 %v1094_v23  ;;  %v261_v12 = vld [vmem:[%s2883_s2 + $0x110] sm:$0xff] }
  0xfa   : > { %v1081_v22 = vadd.f32 %v1080_v19, %v1068_v18  ;;  %v1120_v18 = vmul.f32 %v2526_v30, %v261_v12  ;;  %v254_v19 = vld [vmem:[%s2883_s2 + $0xd8] sm:$0xff] }
  0xfc   : > { %v2572_v25 = vperm.slane %v1081_v22, 0  ;;  %v263_v22 = vld [vmem:[%s2883_s2 + $0x120] sm:$0xff] }
  0xfe   : > { %v1087_v26 = vmul.f32 %v2572_v25, %v228_v24  ;;  %v1089_v34 = vmul.f32 %v2572_v25, %v230_v33  ;;  %v1091_v38 = vmul.f32 %v2572_v25, %v232_v37  ;;  %v1093_v42 = vmul.f32 %v2572_v25, %v234_v41  ;;  %v267_v37 = vld [vmem:[%s2883_s2 + $0x140] sm:$0xff]  ;;  %v260_v41 = vld [vmem:[%s2883_s2 + $0x108] sm:$0xff] }
  0xff   : > { %v1069_v28 = vpop.f32.mrf.mxu2  ;;  %v1095_v46 = vmul.f32 %v2572_v25, %v236_v45  ;;  %v1097_v49 = vmul.f32 %v2572_v25, %v238_v13  ;;  %v1099_v27 = vmul.f32 %v2572_v25, %v240_v17  ;;  %v1101_v53 = vmul.f32 %v2572_v25, %v242_v14 }
 0x100   : > { %v1082_v31 = vpop.f32.mrf.mxu3  ;;  %1235 = vmatmul.f32.vlgmr.msrb.gmra.mxu1 %v1087_v26  ;;  %1407 = vmatmul.f32.vlgmr.msrb.gmra.mxu3 %v1087_v26  ;;  %v1103_v57 = vmul.f32 %v2572_v25, %v244_v56  ;;  %v1105_v61 = vmul.f32 %v2572_v25, %v246_v60  ;;  %v1107_v1 = vmul.f32 %v2572_v25, %v248_v0  ;;  %v256_v26 = vld [vmem:[%s2883_s2 + $0xe8] sm:$0xff] }
 0x101   : > { %1164 = vmatmul.f32.gmra.mxu0 %v1096_v32  ;;  %1336 = vmatmul.f32.gmra.mxu2 %v1096_v32  ;;  %v1109_v5 = vmul.f32 %v2572_v25, %v250_v4  ;;  %v1111_v10 = vmul.f32 %v2572_v25, %v252_v9  ;;  %v1113_v20 = vmul.f32 %v2572_v25, %v254_v19  ;;  %v265_v31 = vld [vmem:[%s2883_s2 + $0x130] sm:$0xff]  ;;  %v266_v4 = vld [vmem:[%s2883_s2 + $0x138] sm:$0xff] }
 0x102   : > { %v1122_v24 = vmul.f32 %v2526_v30, %v263_v22  ;;  %v1115_v28 = vmul.f32 %v2572_v25, %v256_v26  ;;  %v1124_v33 = vmul.f32 %v2526_v30, %v265_v31  ;;  %v1119_v45 = vmul.f32 %v2572_v25, %v260_v41 }
 0x103   : > { %v1125_v9 = vmul.f32 %v2572_v25, %v266_v4 }
 0x108   : > { %1238 = vmatmul.f32.gmra.mxu1 %v1089_v34  ;;  %1410 = vmatmul.f32.gmra.mxu3 %v1089_v34  ;;  %v258_v34 = vld [vmem:[%s2883_s2 + $0xf8] sm:$0xff] }
 0x109   : > { %1167 = vmatmul.f32.gmra.mxu0 %v1098_v36  ;;  %1339 = vmatmul.f32.gmra.mxu2 %v1098_v36  ;;  %v1117_v35 = vmul.f32 %v2572_v25, %v258_v34 }
 0x110   : > { %1241 = vmatmul.f32.gmra.mxu1 %v1091_v38  ;;  %1413 = vmatmul.f32.gmra.mxu3 %v1091_v38  ;;  %v2704_v38 = vstv %s337_s8 }
 0x111   : > { %1170 = vmatmul.f32.gmra.mxu0 %v1100_v40  ;;  %1342 = vmatmul.f32.gmra.mxu2 %v1100_v40  ;;  %v1126_v40 = vmul.f32 %v2526_v30, %v267_v37 }
 0x118   : > { %1244 = vmatmul.f32.gmra.mxu1 %v1093_v42  ;;  %1416 = vmatmul.f32.gmra.mxu3 %v1093_v42 }
 0x119   : > { %1173 = vmatmul.f32.gmra.mxu0 %v1102_v44  ;;  %1345 = vmatmul.f32.gmra.mxu2 %v1102_v44 }
 0x120   : > { %1247 = vmatmul.f32.gmra.mxu1 %v1095_v46  ;;  %1419 = vmatmul.f32.gmra.mxu3 %v1095_v46 }
 0x121   : > { %1176 = vmatmul.f32.gmra.mxu0 %v1104_v48  ;;  %1348 = vmatmul.f32.gmra.mxu2 %v1104_v48 }
 0x128   : > { %1250 = vmatmul.f32.gmra.mxu1 %v1097_v49  ;;  %1422 = vmatmul.f32.gmra.mxu3 %v1097_v49  ;;  %v1128_v49 = vmul.f32 %v2526_v30, %v269_v47 }
 0x129   : > { %1179 = vmatmul.f32.gmra.mxu0 %v1106_v16  ;;  %1351 = vmatmul.f32.gmra.mxu2 %v1106_v16  ;;  %v262_v16 = vld [vmem:[%s2883_s2 + $0x118] sm:$0xff] }
 0x12a   : > { %v1121_v14 = vmul.f32 %v2572_v25, %v262_v16 }
 0x130   : > { %1253 = vmatmul.f32.gmra.mxu1 %v1099_v27  ;;  %1425 = vmatmul.f32.gmra.mxu3 %v1099_v27 }
 0x131   : > { %1182 = vmatmul.f32.gmra.mxu0 %v1108_v52  ;;  %1354 = vmatmul.f32.gmra.mxu2 %v1108_v52 }
 0x138   : > { %1256 = vmatmul.f32.gmra.mxu1 %v1101_v53  ;;  %1428 = vmatmul.f32.gmra.mxu3 %v1101_v53 }
 0x139   : > { %1185 = vmatmul.f32.gmra.mxu0 %v1110_v55  ;;  %1357 = vmatmul.f32.gmra.mxu2 %v1110_v55 }
 0x140   : > { %1259 = vmatmul.f32.gmra.mxu1 %v1103_v57  ;;  %1431 = vmatmul.f32.gmra.mxu3 %v1103_v57  ;;  %v1130_v57 = vmul.f32 %v2526_v30, %v271_v54 }
 0x141   : > { %1188 = vmatmul.f32.gmra.mxu0 %v1112_v59  ;;  %1360 = vmatmul.f32.gmra.mxu2 %v1112_v59  ;;  %v264_v59 = vld [vmem:[%s2883_s2 + $0x128] sm:$0xff] }
 0x142   : > { %v1123_v0 = vmul.f32 %v2572_v25, %v264_v59 }
 0x148   : > { %1262 = vmatmul.f32.gmra.mxu1 %v1105_v61  ;;  %1434 = vmatmul.f32.gmra.mxu3 %v1105_v61 }
 0x149   : > { %1191 = vmatmul.f32.gmra.mxu0 %v1114_v63  ;;  %1363 = vmatmul.f32.gmra.mxu2 %v1114_v63 }
 0x150   : > { %1265 = vmatmul.f32.gmra.mxu1 %v1107_v1  ;;  %1437 = vmatmul.f32.gmra.mxu3 %v1107_v1 }
 0x151   : > { %1194 = vmatmul.f32.gmra.mxu0 %v1116_v3  ;;  %1366 = vmatmul.f32.gmra.mxu2 %v1116_v3 }
 0x155   : > { %v1150_v7 = vpop.f32.mrf.mxu0 }
 0x156   : > { %v1151_v42 = vadd.f32 %v1150_v7, %v2704_v38 }
 0x158   : > { %1268 = vmatmul.f32.gmra.mxu1 %v1109_v5  ;;  %1440 = vmatmul.f32.gmra.mxu3 %v1109_v5 }
 0x159   : > { %1197 = vmatmul.f32.gmra.mxu0 %v1118_v8  ;;  %1369 = vmatmul.f32.gmra.mxu2 %v1118_v8 }
 0x15b   : > { %v1322_v11 = vpop.f32.mrf.mxu2 }
 0x15c   : > { %v1323_v13 = vadd.f32 %v1322_v11, %v2704_v38 }
 0x15d   : > { %v1153_v15 = vpop.f32.mrf.mxu0 }
 0x15e   : > { %v1154_v17 = vadd.f32 %v1153_v15, %v2704_v38  ;;  %v268_v15 = vld [vmem:[%s2883_s2 + $0x148] sm:$0xff] }
 0x160   : > { %1271 = vmatmul.f32.gmra.mxu1 %v1111_v10  ;;  %1443 = vmatmul.f32.gmra.mxu3 %v1111_v10 }
 0x161   : > { %1200 = vmatmul.f32.gmra.mxu0 %v1120_v18  ;;  %1372 = vmatmul.f32.gmra.mxu2 %v1120_v18 }
 0x163   : > { %v1325_v21 = vpop.f32.mrf.mxu2 }
 0x164   : > { %v1326_v56 = vadd.f32 %v1325_v21, %v2704_v38 }
 0x165   : > { %v1156_v23 = vpop.f32.mrf.mxu0 }
 0x166   : > { %v1157_v60 = vadd.f32 %v1156_v23, %v2704_v38  ;;  %v1127_v23 = vmul.f32 %v2572_v25, %v268_v15 }
 0x168   : > { %1274 = vmatmul.f32.gmra.mxu1 %v1113_v20  ;;  %1446 = vmatmul.f32.gmra.mxu3 %v1113_v20 }
 0x169   : > { %1203 = vmatmul.f32.gmra.mxu0 %v1122_v24  ;;  %1375 = vmatmul.f32.gmra.mxu2 %v1122_v24 }
 0x16b   : > { %v2687_v29 = vpop.f32.mrf.mxu2 }
 0x16c   : > { %v1329_v30 = vadd.f32 %v2687_v29, %v2704_v38  ;;  %v270_v29 = vld [vmem:[%s2883_s2 + $0x158] sm:$0xff] }
 0x16d   : > { %v2692_v32 = vpop.f32.mrf.mxu0 }
 0x16e   : > { %v1160_v5 = vadd.f32 %v2692_v32, %v2704_v38 }
 0x170   : > { %1277 = vmatmul.f32.gmra.mxu1 %v1115_v28  ;;  %1449 = vmatmul.f32.gmra.mxu3 %v1115_v28 }
 0x171   : > { %1206 = vmatmul.f32.gmra.mxu0 %v1124_v33  ;;  %1378 = vmatmul.f32.gmra.mxu2 %v1124_v33 }
 0x173   : > { %v2699_v36 = vpop.f32.mrf.mxu2 }
 0x174   : > { %v1332_v11 = vadd.f32 %v2699_v36, %v2704_v38 }
 0x175   : > { %v2706_v39 = vpop.f32.mrf.mxu0 }
 0x176   : > { %v1163_v18 = vadd.f32 %v2706_v39, %v2704_v38 }
 0x178   : > { %1280 = vmatmul.f32.gmra.mxu1 %v1117_v35  ;;  %1452 = vmatmul.f32.gmra.mxu3 %v1117_v35  ;;  %v1129_v35 = vmul.f32 %v2572_v25, %v270_v29 }
 0x179   : > { %1209 = vmatmul.f32.gmra.mxu0 %v1126_v40  ;;  %1381 = vmatmul.f32.gmra.mxu2 %v1126_v40  ;;  %v272_v40 = vld [vmem:[%s2883_s2 + $0x168] sm:$0xf] }
 0x17b   : > { %v2720_v46 = vpop.f32.mrf.mxu2 }
 0x17c   : > { %v1335_v24 = vadd.f32 %v2720_v46, %v2704_v38  ;;  %v1131_v46 = vmul.f32 %v2572_v25, %v272_v40 }
 0x17d   : > { %v1236_v43 = vpop.f32.mrf.mxu1 }
 0x17e   : > { %v1237_v44 = vadd.f32 %v1236_v43, %v1151_v42  ;;  %v2726_v48 = vpop.f32.mrf.mxu0 }
 0x17f   : > { %v1166_v31 = vadd.f32 %v2726_v48, %v2704_v38 }
 0x180   : > { %1477 = vst [vmem:[%s2717_s18] sm:$0xff] %v1237_v44  ;;  %1283 = vmatmul.f32.gmra.mxu1 %v1119_v45  ;;  %1455 = vmatmul.f32.gmra.mxu3 %v1119_v45 }
 0x181   : > { %1212 = vmatmul.f32.gmra.mxu0 %v1128_v49  ;;  %1384 = vmatmul.f32.gmra.mxu2 %v1128_v49 }
 0x183   : > { %v1408_v50 = vpop.f32.mrf.mxu3 }
 0x184   : > { %v1409_v27 = vadd.f32 %v1408_v50, %v1323_v13  ;;  %v2737_v53 = vpop.f32.mrf.mxu2 }
 0x185   : > { %v1239_v51 = vpop.f32.mrf.mxu1  ;;  %v1338_v37 = vadd.f32 %v2737_v53, %v2704_v38 }
 0x186   : > { %1479 = vst.msk [vmem:[%s2717_s18 + $0x8] sm:$0xff] %vm1478_vm0, %v1409_v27  ;;  %v1240_v52 = vadd.f32 %v1239_v51, %v1154_v17  ;;  %v1168_v55 = vpop.f32.mrf.mxu0 }
 0x187   : > { %v1169_v41 = vadd.f32 %v1168_v55, %v2704_v38 }
 0x188   : > { %1480 = vst [vmem:[%s2717_s18 + $0x10] sm:$0xff] %v1240_v52  ;;  %1286 = vmatmul.f32.gmra.mxu1 %v1121_v14  ;;  %1458 = vmatmul.f32.gmra.mxu3 %v1121_v14 }
 0x189   : > { %1215 = vmatmul.f32.gmra.mxu0 %v1130_v57  ;;  %1387 = vmatmul.f32.gmra.mxu2 %v1130_v57 }
 0x18b   : > { %v1411_v58 = vpop.f32.mrf.mxu3 }
 0x18c   : > { %v1412_v61 = vadd.f32 %v1411_v58, %v1326_v56  ;;  %v1340_v1 = vpop.f32.mrf.mxu2 }
 0x18d   : > { %v1242_v62 = vpop.f32.mrf.mxu1  ;;  %v1341_v48 = vadd.f32 %v1340_v1, %v2704_v38 }
 0x18e   : > { %1481 = vst.msk [vmem:[%s2717_s18 + $0x18] sm:$0xff] %vm1478_vm0, %v1412_v61  ;;  %v1243_v63 = vadd.f32 %v1242_v62, %v1157_v60  ;;  %v1171_v2 = vpop.f32.mrf.mxu0 }
 0x18f   : > { %v1172_v49 = vadd.f32 %v1171_v2, %v2704_v38 }
 0x190   : > { %1482 = vst [vmem:[%s2717_s18 + $0x20] sm:$0xff] %v1243_v63  ;;  %1289 = vmatmul.f32.gmra.mxu1 %v1123_v0  ;;  %1461 = vmatmul.f32.gmra.mxu3 %v1123_v0 }
 0x193   : > { %v1414_v3 = vpop.f32.mrf.mxu3 }
 0x194   : > { %v1415_v6 = vadd.f32 %v1414_v3, %v1329_v30  ;;  %v1343_v10 = vpop.f32.mrf.mxu2 }
 0x195   : > { %v1245_v7 = vpop.f32.mrf.mxu1  ;;  %v1344_v25 = vadd.f32 %v1343_v10, %v2704_v38 }
 0x196   : > { %1483 = vst.msk [vmem:[%s2717_s18 + $0x28] sm:$0xff] %vm1478_vm0, %v1415_v6  ;;  %v1246_v8 = vadd.f32 %v1245_v7, %v1160_v5  ;;  %v1174_v20 = vpop.f32.mrf.mxu0 }
 0x197   : > { %v1175_v14 = vadd.f32 %v1174_v20, %v2704_v38 }
 0x198   : > { %1484 = vst [vmem:[%s2717_s18 + $0x30] sm:$0xff] %v1246_v8  ;;  %1292 = vmatmul.f32.gmra.mxu1 %v1125_v9  ;;  %1464 = vmatmul.f32.gmra.mxu3 %v1125_v9 }
 0x19b   : > { %v1417_v12 = vpop.f32.mrf.mxu3 }
 0x19c   : > { %v1418_v19 = vadd.f32 %v1417_v12, %v1332_v11  ;;  %v1346_v26 = vpop.f32.mrf.mxu2 }
 0x19d   : > { %v1248_v21 = vpop.f32.mrf.mxu1  ;;  %v1347_v57 = vadd.f32 %v1346_v26, %v2704_v38 }
 0x19e   : > { %1485 = vst.msk [vmem:[%s2717_s18 + $0x38] sm:$0xff] %vm1478_vm0, %v1418_v19  ;;  %v1249_v22 = vadd.f32 %v1248_v21, %v1163_v18  ;;  %v1177_v36 = vpop.f32.mrf.mxu0 }
 0x19f   : > { %v1178_v59 = vadd.f32 %v1177_v36, %v2704_v38 }
 0x1a0   : > { %1486 = vst [vmem:[%s2717_s18 + $0x40] sm:$0xff] %v1249_v22  ;;  %1295 = vmatmul.f32.gmra.mxu1 %v1127_v23  ;;  %1467 = vmatmul.f32.gmra.mxu3 %v1127_v23 }
 0x1a3   : > { %v1420_v28 = vpop.f32.mrf.mxu3 }
 0x1a4   : > { %v1421_v32 = vadd.f32 %v1420_v28, %v1335_v24  ;;  %v1349_v43 = vpop.f32.mrf.mxu2 }
 0x1a5   : > { %v1251_v33 = vpop.f32.mrf.mxu1  ;;  %v1350_v0 = vadd.f32 %v1349_v43, %v2704_v38 }
 0x1a6   : > { %1487 = vst.msk [vmem:[%s2717_s18 + $0x48] sm:$0xff] %vm1478_vm0, %v1421_v32  ;;  %v1252_v34 = vadd.f32 %v1251_v33, %v1166_v31  ;;  %v1180_v47 = vpop.f32.mrf.mxu0 }
 0x1a7   : > { %v1181_v2 = vadd.f32 %v1180_v47, %v2704_v38 }
 0x1a8   : > { %1488 = vst [vmem:[%s2717_s18 + $0x50] sm:$0xff] %v1252_v34  ;;  %1298 = vmatmul.f32.gmra.mxu1 %v1129_v35  ;;  %1470 = vmatmul.f32.gmra.mxu3 %v1129_v35 }
 0x1ab   : > { %v1423_v39 = vpop.f32.mrf.mxu3 }
 0x1ac   : > { %v1424_v42 = vadd.f32 %v1423_v39, %v1338_v37  ;;  %v1352_v27 = vpop.f32.mrf.mxu2 }
 0x1ad   : > { %v1254_v44 = vpop.f32.mrf.mxu1  ;;  %v1353_v7 = vadd.f32 %v1352_v27, %v2704_v38 }
 0x1ae   : > { %1489 = vst.msk [vmem:[%s2717_s18 + $0x58] sm:$0xff] %vm1478_vm0, %v1424_v42  ;;  %v1255_v45 = vadd.f32 %v1254_v44, %v1169_v41  ;;  %v1183_v51 = vpop.f32.mrf.mxu0 }
 0x1af   : > { %v1184_v9 = vadd.f32 %v1183_v51, %v2704_v38 }
 0x1b0   : > { %1490 = vst [vmem:[%s2717_s18 + $0x60] sm:$0xff] %v1255_v45  ;;  %1301 = vmatmul.f32.gmra.mxu1 %v1131_v46  ;;  %1473 = vmatmul.f32.gmra.mxu3 %v1131_v46 }
 0x1b3   : > { %v1426_v13 = vpop.f32.mrf.mxu3 }
 0x1b4   : > { %v1427_v50 = vadd.f32 %v1426_v13, %v1341_v48  ;;  %v1355_v56 = vpop.f32.mrf.mxu2 }
 0x1b5   : > { %v1257_v16 = vpop.f32.mrf.mxu1  ;;  %v1356_v19 = vadd.f32 %v1355_v56, %v2704_v38 }
 0x1b6   : > { %1491 = vst.msk [vmem:[%s2717_s18 + $0x68] sm:$0xff] %vm1478_vm0, %v1427_v50  ;;  %v1258_v17 = vadd.f32 %v1257_v16, %v1172_v49  ;;  %v1186_v61 = vpop.f32.mrf.mxu0 }
 0x1b7   : > { %v1187_v21 = vadd.f32 %v1186_v61, %v2704_v38 }
 0x1b8   : > { %1492 = vst [vmem:[%s2717_s18 + $0x70] sm:$0xff] %v1258_v17 }
 0x1bb   : > { %v1429_v52 = vpop.f32.mrf.mxu3 }
 0x1bc   : > { %v1430_v53 = vadd.f32 %v1429_v52, %v1344_v25  ;;  %v1358_v1 = vpop.f32.mrf.mxu2 }
 0x1bd   : > { %v1260_v54 = vpop.f32.mrf.mxu1  ;;  %v1359_v28 = vadd.f32 %v1358_v1, %v2704_v38 }
 0x1be   : > { %1493 = vst.msk [vmem:[%s2717_s18 + $0x78] sm:$0xff] %vm1478_vm0, %v1430_v53  ;;  %v1261_v55 = vadd.f32 %v1260_v54, %v1175_v14  ;;  %v1189_v6 = vpop.f32.mrf.mxu0 }
 0x1bf   : > { %v1190_v32 = vadd.f32 %v1189_v6, %v2704_v38 }
 0x1c0   : > { %1494 = vst [vmem:[%s2717_s18 + $0x80] sm:$0xff] %v1261_v55 }
 0x1c3   : > { %v1432_v58 = vpop.f32.mrf.mxu3 }
 0x1c4   : > { %v1433_v60 = vadd.f32 %v1432_v58, %v1347_v57  ;;  %v1361_v11 = vpop.f32.mrf.mxu2 }
 0x1c5   : > { %v1263_v62 = vpop.f32.mrf.mxu1  ;;  %v1362_v37 = vadd.f32 %v1361_v11, %v2704_v38 }
 0x1c6   : > { %1495 = vst.msk [vmem:[%s2717_s18 + $0x88] sm:$0xff] %vm1478_vm0, %v1433_v60  ;;  %v1264_v63 = vadd.f32 %v1263_v62, %v1178_v59  ;;  %v1192_v18 = vpop.f32.mrf.mxu0 }
 0x1c7   : > { %v1193_v40 = vadd.f32 %v1192_v18, %v2704_v38 }
 0x1c8   : > { %1496 = vst [vmem:[%s2717_s18 + $0x90] sm:$0xff] %v1264_v63 }
 0x1cb   : > { %v1435_v30 = vpop.f32.mrf.mxu3 }
 0x1cc   : > { %v1436_v3 = vadd.f32 %v1435_v30, %v1350_v0  ;;  %v1364_v26 = vpop.f32.mrf.mxu2 }
 0x1cd   : > { %v1266_v4 = vpop.f32.mrf.mxu1  ;;  %v1365_v45 = vadd.f32 %v1364_v26, %v2704_v38 }
 0x1ce   : > { %1497 = vst.msk [vmem:[%s2717_s18 + $0x98] sm:$0xff] %vm1478_vm0, %v1436_v3  ;;  %v1267_v5 = vadd.f32 %v1266_v4, %v1181_v2  ;;  %v1195_v29 = vpop.f32.mrf.mxu0 }
 0x1cf   : > { %v1196_v48 = vadd.f32 %v1195_v29, %v2704_v38 }
 0x1d0   : > { %1498 = vst [vmem:[%s2717_s18 + $0xa0] sm:$0xff] %v1267_v5 }
 0x1d3   : > { %v1438_v8 = vpop.f32.mrf.mxu3 }
 0x1d4   : > { %v1439_v10 = vadd.f32 %v1438_v8, %v1353_v7  ;;  %v1367_v36 = vpop.f32.mrf.mxu2 }
 0x1d5   : > { %v1269_v12 = vpop.f32.mrf.mxu1  ;;  %v1368_v17 = vadd.f32 %v1367_v36, %v2704_v38 }
 0x1d6   : > { %1499 = vst.msk [vmem:[%s2717_s18 + $0xa8] sm:$0xff] %vm1478_vm0, %v1439_v10  ;;  %v1270_v15 = vadd.f32 %v1269_v12, %v1184_v9  ;;  %v1198_v42 = vpop.f32.mrf.mxu0 }
 0x1d7   : > { %v1199_v25 = vadd.f32 %v1198_v42, %v2704_v38 }
 0x1d8   : > { %1500 = vst [vmem:[%s2717_s18 + $0xb0] sm:$0xff] %v1270_v15 }
 0x1db   : > { %v1441_v20 = vpop.f32.mrf.mxu3 }
 0x1dc   : > { %v1442_v22 = vadd.f32 %v1441_v20, %v1356_v19  ;;  %v1370_v46 = vpop.f32.mrf.mxu2 }
 0x1dd   : > { %v1272_v23 = vpop.f32.mrf.mxu1  ;;  %v1371_v55 = vadd.f32 %v1370_v46, %v2704_v38 }
 0x1de   : > { %1501 = vst.msk [vmem:[%s2717_s18 + $0xb8] sm:$0xff] %vm1478_vm0, %v1442_v22  ;;  %v1273_v24 = vadd.f32 %v1272_v23, %v1187_v21  ;;  %v1201_v16 = vpop.f32.mrf.mxu0 }
 0x1df   : > { %v1202_v57 = vadd.f32 %v1201_v16, %v2704_v38 }
 0x1e0   : > { %1502 = vst [vmem:[%s2717_s18 + $0xc0] sm:$0xff] %v1273_v24 }
 0x1e3   : > { %v1444_v31 = vpop.f32.mrf.mxu3 }
 0x1e4   : > { %v1445_v33 = vadd.f32 %v1444_v31, %v1359_v28  ;;  %v1373_v52 = vpop.f32.mrf.mxu2 }
 0x1e5   : > { %v1275_v34 = vpop.f32.mrf.mxu1  ;;  %v1374_v62 = vadd.f32 %v1373_v52, %v2704_v38 }
 0x1e6   : > { %1503 = vst.msk [vmem:[%s2717_s18 + $0xc8] sm:$0xff] %vm1478_vm0, %v1445_v33  ;;  %v1276_v35 = vadd.f32 %v1275_v34, %v1190_v32  ;;  %v1204_v54 = vpop.f32.mrf.mxu0 }
 0x1e7   : > { %v1205_v1 = vadd.f32 %v1204_v54, %v2704_v38 }
 0x1e8   : > { %1504 = vst [vmem:[%s2717_s18 + $0xd0] sm:$0xff] %v1276_v35 }
 0x1eb   : > { %v1447_v39 = vpop.f32.mrf.mxu3 }
 0x1ec   : > { %v1448_v41 = vadd.f32 %v1447_v39, %v1362_v37  ;;  %v1376_v61 = vpop.f32.mrf.mxu2 }
 0x1ed   : > { %v1278_v43 = vpop.f32.mrf.mxu1  ;;  %v1377_v5 = vadd.f32 %v1376_v61, %v2704_v38 }
 0x1ee   : > { %1505 = vst.msk [vmem:[%s2717_s18 + $0xd8] sm:$0xff] %vm1478_vm0, %v1448_v41  ;;  %v1279_v44 = vadd.f32 %v1278_v43, %v1193_v40  ;;  %v1207_v63 = vpop.f32.mrf.mxu0 }
 0x1ef   : > { %v1208_v7 = vadd.f32 %v1207_v63, %v2704_v38 }
 0x1f0   : > { %1506 = vst [vmem:[%s2717_s18 + $0xe0] sm:$0xff] %v1279_v44 }
 0x1f3   : > { %v1450_v47 = vpop.f32.mrf.mxu3 }
 0x1f4   : > { %v1451_v13 = vadd.f32 %v1450_v47, %v1365_v45  ;;  %v1379_v4 = vpop.f32.mrf.mxu2 }
 0x1f5   : > { %v1281_v49 = vpop.f32.mrf.mxu1  ;;  %v1380_v12 = vadd.f32 %v1379_v4, %v2704_v38 }
 0x1f6   : > { %1507 = vst.msk [vmem:[%s2717_s18 + $0xe8] sm:$0xff] %vm1478_vm0, %v1451_v13  ;;  %v1282_v50 = vadd.f32 %v1281_v49, %v1196_v48  ;;  %v1210_v9 = vpop.f32.mrf.mxu0 }
 0x1f7   : > { %v1211_v19 = vadd.f32 %v1210_v9, %v2704_v38 }
 0x1f8   : > { %1508 = vst [vmem:[%s2717_s18 + $0xf0] sm:$0xff] %v1282_v50 }
 0x1fb   : > { %v1453_v27 = vpop.f32.mrf.mxu3 }
 0x1fc   : > { %v1454_v51 = vadd.f32 %v1453_v27, %v1368_v17  ;;  %v1382_v15 = vpop.f32.mrf.mxu2 }
 0x1fd   : > { %v1284_v14 = vpop.f32.mrf.mxu1  ;;  %v1383_v24 = vadd.f32 %v1382_v15, %v2704_v38 }
 0x1fe   : > { %1509 = vst.msk [vmem:[%s2717_s18 + $0xf8] sm:$0xff] %vm1478_vm0, %v1454_v51  ;;  %v1285_v53 = vadd.f32 %v1284_v14, %v1199_v25  ;;  %v1213_v23 = vpop.f32.mrf.mxu0 }
 0x1ff   : > { %v1214_v28 = vadd.f32 %v1213_v23, %v2704_v38 }
 0x200   : > { %1510 = vst [vmem:[%s2717_s18 + $0x100] sm:$0xff] %v1285_v53 }
 0x203   : > { %v1456_v56 = vpop.f32.mrf.mxu3 }
 0x204   : > { %v1457_v58 = vadd.f32 %v1456_v56, %v1371_v55  ;;  %v1385_v31 = vpop.f32.mrf.mxu2 }
 0x205   : > { %v1287_v59 = vpop.f32.mrf.mxu1  ;;  %v1386_v35 = vadd.f32 %v1385_v31, %v2704_v38 }
 0x206   : > { %1511 = vst.msk [vmem:[%s2717_s18 + $0x108] sm:$0xff] %vm1478_vm0, %v1457_v58  ;;  %v1288_v60 = vadd.f32 %v1287_v59, %v1202_v57  ;;  %v1216_v34 = vpop.f32.mrf.mxu0 }
 0x207   : > { %v1217_v37 = vadd.f32 %v1216_v34, %v2704_v38 }
 0x208   : > { %1512 = vst [vmem:[%s2717_s18 + $0x110] sm:$0xff] %v1288_v60 }
 0x20b   : > { %v1459_v0 = vpop.f32.mrf.mxu3 }
 0x20c   : > { %v1460_v30 = vadd.f32 %v1459_v0, %v1374_v62  ;;  %v1388_v42 = vpop.f32.mrf.mxu2 }
 0x20d   : > { %v1290_v2 = vpop.f32.mrf.mxu1  ;;  %v1389_v43 = vadd.f32 %v1388_v42, %v2704_v38 }
 0x20e   : > { %1513 = vst.msk [vmem:[%s2717_s18 + $0x118] sm:$0xff] %vm1478_vm0, %v1460_v30  ;;  %v1291_v3 = vadd.f32 %v1290_v2, %v1205_v1 }
 0x210   : > { %1514 = vst [vmem:[%s2717_s18 + $0x120] sm:$0xff] %v1291_v3 }
 0x213   : > { %v1462_v6 = vpop.f32.mrf.mxu3 }
 0x214   : > { %v1463_v8 = vadd.f32 %v1462_v6, %v1377_v5 }
 0x215   : > { %v1293_v10 = vpop.f32.mrf.mxu1 }
 0x216   : > { %1515 = vst.msk [vmem:[%s2717_s18 + $0x128] sm:$0xff] %vm1478_vm0, %v1463_v8  ;;  %v1294_v11 = vadd.f32 %v1293_v10, %v1208_v7 }
 0x218   : > { %1516 = vst [vmem:[%s2717_s18 + $0x130] sm:$0xff] %v1294_v11 }
 0x21b   : > { %v1465_v18 = vpop.f32.mrf.mxu3 }
 0x21c   : > { %v1466_v20 = vadd.f32 %v1465_v18, %v1380_v12 }
 0x21d   : > { %v1296_v21 = vpop.f32.mrf.mxu1 }
 0x21e   : > { %1517 = vst.msk [vmem:[%s2717_s18 + $0x138] sm:$0xff] %vm1478_vm0, %v1466_v20  ;;  %v1297_v22 = vadd.f32 %v1296_v21, %v1211_v19 }
 0x220   : > { %1518 = vst [vmem:[%s2717_s18 + $0x140] sm:$0xff] %v1297_v22 }
 0x223   : > { %v1468_v26 = vpop.f32.mrf.mxu3 }
 0x224   : > { %v1469_v29 = vadd.f32 %v1468_v26, %v1383_v24 }
 0x225   : > { %v1299_v32 = vpop.f32.mrf.mxu1 }
 0x226   : > { %1519 = vst.msk [vmem:[%s2717_s18 + $0x148] sm:$0xff] %vm1478_vm0, %v1469_v29  ;;  %v1300_v33 = vadd.f32 %v1299_v32, %v1214_v28 }
 0x228   : > { %1520 = vst [vmem:[%s2717_s18 + $0x150] sm:$0xff] %v1300_v33 }
 0x22b   : > { %v1471_v36 = vpop.f32.mrf.mxu3 }
 0x22c   : > { %v1472_v39 = vadd.f32 %v1471_v36, %v1386_v35 }
 0x22d   : > { %v1302_v40 = vpop.f32.mrf.mxu1 }
 0x22e   : > { %1521 = vst.msk [vmem:[%s2717_s18 + $0x158] sm:$0xff] %vm1478_vm0, %v1472_v39  ;;  %v1303_v41 = vadd.f32 %v1302_v40, %v1217_v37 }
 0x230   : > { %1522 = vst [vmem:[%s2717_s18 + $0x160] sm:$0xf] %v1303_v41 }
 0x233   : > { %v1474_v44 = vpop.f32.mrf.mxu3 }
 0x234   : > { %v1475_v45 = vadd.f32 %v1474_v44, %v1389_v43 }
 0x236   : > { %1524 = vst.msk [vmem:[%s2717_s18 + $0x168] sm:$0xf] %vm1523_vm1, %v1475_v45 }
 0x237 PF: > { %s16_s20 = sadd.s32 1, %s2085_s20  }
 0x238   : > { %p13_p4 = scmp.ge.s32.totalorder %s16_s20, 4  }
 0x23a   :  { %15 = sbr.rel (!%p13_p4) target bundleno = 2 (0x2), region = 70 }

</bundles_post_ra>
